<compile_context>
chip_gen: v5e
topology: v5e:2x2
jax: 0.10.0
libtpu: 0.0.40
codegen_flags: <defaults>
</compile_context>

<pallas_src>
import functools

import jax
import jax.numpy as jnp
from jax.experimental import pallas as pl
from jax.experimental.pallas import tpu as pltpu


def _attention_kernel(x_ref, wqkv_ref, wp_ref, bp_ref,
                      out_ref, orth_ref,
                      qkv_s, o_s,
                      *, num_heads, head_dim, approx_recip):
    """One batch block of the ViT attention forward.

    Phase 1: fused QKV projection   (Bblk*N, C) @ (C, 3C)  -> qkv_s (cdt)
    Phase 2: per-head attention      static lane slices of qkv_s; one head's
                                     (Bblk, N, N) f32 scores live at a time;
                                     head outputs land in head-concat layout
    Phase 3: fused output projection (Bblk*N, C) @ (C, C) + bias -> out_ref
    """
    Bblk, N, C = x_ref.shape
    H, hd = num_heads, head_dim
    cdt = x_ref.dtype                       # MXU operand dtype (bf16 or f32)

    # ---- Phase 1: fused, lane-dense QKV projection.  The softmax scale is
    # already folded into the q columns of wqkv by the wrapper.  f32
    # accumulation, cast to the MXU operand dtype immediately.
    x2 = x_ref[...].reshape(Bblk * N, C)
    qkv = jnp.dot(x2, wqkv_ref[...], preferred_element_type=jnp.float32)
    qkv_s[...] = qkv.astype(cdt).reshape(Bblk, N, 3 * C)

    # ---- Phase 2: attention, one head at a time.  q/k/v are static lane
    # slices of the scratch (columns are ordered [3, H, hd], matching the
    # nn.Linear qkv layout), so no operand replication and no relayout of x.
    for h in range(H):
        q = qkv_s[:, :, h * hd:(h + 1) * hd]                       # (Bblk,N,hd)
        k = qkv_s[:, :, C + h * hd:C + (h + 1) * hd]
        v = qkv_s[:, :, 2 * C + h * hd:2 * C + (h + 1) * hd]

        s = jnp.einsum('bnd,bmd->bnm', q, k,
                       preferred_element_type=jnp.float32)          # (Bblk,N,N)

        # Pre-softmax scores of query 0 vs all keys (dense full-N row); the
        # wrapper drops key 0 afterwards.
        orth_ref[:, h:h + 1, :] = s[:, 0:1, :].astype(orth_ref.dtype)

        s = s - jnp.max(s, axis=-1, keepdims=True)
        p = jnp.exp(s)
        denom = jnp.sum(p, axis=-1, keepdims=True)
        if approx_recip:
            p = p * pl.reciprocal(denom, approx=True)                # EUP slot
        else:
            p = p / denom                                            # exact parity
        # attn_drop is identity (p = 0.0).

        o_h = jnp.einsum('bnm,bmd->bnd', p.astype(cdt), v,
                         preferred_element_type=jnp.float32)         # (Bblk,N,hd)
        # Head-concat layout (b, n, h*hd + d): exactly the contraction layout
        # of the original w_proj, so phase 3 is one fused full-C matmul.
        o_s[:, :, h * hd:(h + 1) * hd] = o_h.astype(cdt)

    # ---- Phase 3: fused output projection + bias.
    o2 = o_s[...].reshape(Bblk * N, C)
    proj = jnp.dot(o2, wp_ref[...], preferred_element_type=jnp.float32)
    proj = proj + bp_ref[...]                                        # (Bblk*N,C)
    out_ref[...] = proj.reshape(Bblk, N, C).astype(out_ref.dtype)
    # proj_drop is identity (p = 0.0).


def _vmem_budget_bytes():
    """~75% of physical VMEM: ~48 MiB on v7x, ~96 MiB on v5e/v6e."""
    try:
        cap = pltpu.get_tpu_info().vmem_capacity_bytes
    except Exception:
        cap = 64 * 1024 * 1024          # conservative (v7x-sized) fallback
    return int(cap) * 3 // 4


def attention_forward(x, w_qkv, w_proj, b_proj, num_heads, *,
                      compute_dtype=jnp.bfloat16, batch_block=None,
                      vmem_budget_bytes=None):
    """Forward pass of the ViT Attention module.

    x:      (B, N, C)
    w_qkv:  (C, 3C)  columns ordered [3, H, hd]  (nn.Linear weight, transposed)
    w_proj: (C, C)   (nn.Linear weight, transposed)
    b_proj: (C,)
    Returns (out (B, N, C), orth_proto (B, H, N-1)).
    """
    B, N, C = x.shape
    H = num_heads
    assert C % H == 0
    hd = C // H
    scale = hd ** (-0.5)

    cdt = compute_dtype
    csz = jnp.dtype(cdt).itemsize
    xsz = jnp.dtype(x.dtype).itemsize

    # One-time weight prep (plain XLA, outside the kernel): fold the softmax
    # scale into the q columns of the qkv weight and cast to the MXU operand
    # dtype (halves weight DMA bytes in bf16 mode).
    wqkv = jnp.concatenate([w_qkv[:, :C] * scale, w_qkv[:, C:]], axis=1).astype(cdt)
    wp = w_proj.astype(cdt)
    bp = b_proj.reshape(1, C).astype(jnp.float32)
    xq = x.astype(cdt)

    # ---- VMEM byte model -> batch_block -------------------------------------
    if vmem_budget_bytes is None:
        vmem_budget_bytes = _vmem_budget_bytes()

    # Weights + bias (conservatively assume double-buffered; Buffered(1) below
    # halves this when supported).
    w_bytes = (C * 3 * C + C * C) * csz * 2 + C * 4 * 2

    def step_bytes(bb):
        x_blk = bb * N * C * csz * 2                    # x block, double-buffered
        out_blk = bb * N * C * xsz * 2                  # out block, double-buffered
        orth_blk = bb * H * N * 4 * 2                   # orth block, double-buffered
        scratch = bb * N * 3 * C * csz + bb * N * C * csz   # qkv_s + o_s
        temps = (bb * N * 3 * C * 4                     # f32 qkv before the cast
                 + 3 * bb * N * N * 4                   # one head's s/p (+slack)
                 + 2 * bb * N * C * 4)                  # f32 proj (+slack)
        return x_blk + out_blk + orth_blk + scratch + temps

    if batch_block is None:
        divisors = [d for d in range(1, B + 1) if B % d == 0]
        # Keep >= 2 grid steps whenever B allows it (both v7x TensorCores busy,
        # DMA/compute overlap preserved).
        cands = [d for d in divisors if (B // d >= 2 or B == 1)]
        fits = [d for d in cands if w_bytes + step_bytes(d) <= vmem_budget_bytes]
        batch_block = max(fits) if fits else min(cands)
    assert B % batch_block == 0
    grid = (B // batch_block,)
    vmem_limit = int(min(max(w_bytes + step_bytes(batch_block), 16 * 1024 * 1024),
                         vmem_budget_bytes))

    kernel = functools.partial(_attention_kernel, num_heads=H, head_dim=hd,
                               approx_recip=(cdt != jnp.float32))

    out_shapes = (
        jax.ShapeDtypeStruct((B, N, C), x.dtype),        # projected output
        jax.ShapeDtypeStruct((B, H, N), jnp.float32),    # orth, dense (key 0 kept)
    )

    def weight_spec(shape, single_buffer):
        idx = lambda b: (0,) * len(shape)
        if single_buffer:
            return pl.BlockSpec(shape, idx, pipeline_mode=pl.Buffered(1))
        return pl.BlockSpec(shape, idx)

    def run(single_buffer_weights):
        grid_spec = pltpu.PrefetchScalarGridSpec(
            num_scalar_prefetch=0,
            grid=grid,
            in_specs=[
                pl.BlockSpec((batch_block, N, C), lambda b: (b, 0, 0)),      # x
                weight_spec((C, 3 * C), single_buffer_weights),              # w_qkv
                weight_spec((C, C), single_buffer_weights),                  # w_proj
                weight_spec((1, C), single_buffer_weights),                  # bias
            ],
            out_specs=[
                pl.BlockSpec((batch_block, N, C), lambda b: (b, 0, 0)),
                pl.BlockSpec((batch_block, H, N), lambda b: (b, 0, 0)),
            ],
            scratch_shapes=[
                pltpu.VMEM((batch_block, N, 3 * C), cdt),   # fused qkv (head-sliceable)
                pltpu.VMEM((batch_block, N, C), cdt),       # head-concat attn output
            ],
        )
        res = pl.pallas_call(
            kernel,
            out_shape=out_shapes,
            grid_spec=grid_spec,
            compiler_params=pltpu.CompilerParams(
                dimension_semantics=("parallel",),
                vmem_limit_bytes=vmem_limit,
            ),
        )(xq, wqkv, wp, bp)
        jax.block_until_ready(res)
        return res

    try:
        # Weights never change across grid steps -> single-buffer them.
        out, orth_full = run(True)
    except Exception:
        # Fallback if pipeline_mode=pl.Buffered(1) is not supported here.
        out, orth_full = run(False)

    orth = orth_full[:, :, 1:]                           # drop key 0 outside the kernel
    return out, orth


def attention_ref(x, w_qkv, w_proj, b_proj, num_heads):
    """Pure-JAX reference mirroring the PyTorch forward."""
    B, N, C = x.shape
    hd = C // num_heads
    scale = hd ** (-0.5)
    qkv = (x @ w_qkv).reshape(B, N, 3, num_heads, hd).transpose(2, 0, 3, 1, 4)
    q, k, v = qkv[0], qkv[1], qkv[2]                     # (B, H, N, hd)
    attn = jnp.einsum("bhnd,bhmd->bhnm", q, k) * scale
    orth = attn[:, :, 0, 1:]
    attn = jax.nn.softmax(attn, axis=-1)
    o = jnp.einsum("bhnm,bhmd->bhnd", attn, v).transpose(0, 2, 1, 3).reshape(B, N, C)
    return o @ w_proj + b_proj, orth


if __name__ == "__main__":
    B, N, C, H = 2, 8, 32, 4

    key = jax.random.PRNGKey(0)
    k1, k2, k3, k4 = jax.random.split(key, 4)
    x = jax.random.normal(k1, (B, N, C), jnp.float32)
    w_qkv = jax.random.normal(k2, (C, 3 * C), jnp.float32) * 0.05
    w_proj = jax.random.normal(k3, (C, C), jnp.float32) * 0.05
    b_proj = jax.random.normal(k4, (C,), jnp.float32) * 0.01

    ref_out, ref_orth = attention_ref(x, w_qkv, w_proj, b_proj, H)

    # Default perf configuration: bf16 MXU operands, f32 accumulation.
    out, orth = attention_forward(x, w_qkv, w_proj, b_proj, H)
    jax.block_until_ready((out, orth))
    assert out.shape == (B, N, C) and orth.shape == (B, H, N - 1)
    assert jnp.allclose(out, ref_out, atol=2e-2, rtol=2e-2)
    assert jnp.allclose(orth, ref_orth, atol=2e-2, rtol=2e-2)

    # Full-f32 operands + exact softmax normalisation.
    out32, orth32 = attention_forward(x, w_qkv, w_proj, b_proj, H,
                                      compute_dtype=jnp.float32)
    jax.block_until_ready((out32, orth32))
    assert jnp.allclose(out32, ref_out, atol=2e-3, rtol=2e-3)
    assert jnp.allclose(orth32, ref_orth, atol=2e-3, rtol=2e-3)

    print("KERNEL_OK")
</pallas_src>

<mosaic_0001>
module attributes {stable_mosaic.version = 11 : i64} {
  func.func @_attention_kernel(%arg0: i32, %arg1: memref<1x8x32xbf16, #tpu.memory_space<vmem>>, %arg2: memref<32x96xbf16, #tpu.memory_space<vmem>>, %arg3: memref<32x32xbf16, #tpu.memory_space<vmem>>, %arg4: memref<1x32xf32, #tpu.memory_space<vmem>>, %arg5: memref<1x8x32xf32, #tpu.memory_space<vmem>>, %arg6: memref<1x4x8xf32, #tpu.memory_space<vmem>>, %arg7: memref<1x8x96xbf16, #tpu.memory_space<vmem>>, %arg8: memref<1x8x32xbf16, #tpu.memory_space<vmem>>) attributes {dimension_semantics = [#tpu.dimension_semantics<parallel>], iteration_bounds = array<i64: 2>, scalar_prefetch = 0 : i64, scratch_operands = 2 : i64, tpu.core_type = #tpu.core_type<tc>, window_params = [{transform_indices = @transform_0, window_bounds = array<i64: 1, 8, 32>}, {pipeline_mode = #tpu.pipeline_mode<synchronous>, transform_indices = @transform_1, window_bounds = array<i64: 32, 96>}, {pipeline_mode = #tpu.pipeline_mode<synchronous>, transform_indices = @transform_2, window_bounds = array<i64: 32, 32>}, {pipeline_mode = #tpu.pipeline_mode<synchronous>, transform_indices = @transform_3, window_bounds = array<i64: 1, 32>}, {transform_indices = @transform_4, window_bounds = array<i64: 1, 8, 32>}, {transform_indices = @transform_5, window_bounds = array<i64: 1, 4, 8>}]} {
    %c0 = arith.constant 0 : index
    %c0_0 = arith.constant 0 : index
    %c0_1 = arith.constant 0 : index
    %0 = vector.load %arg1[%c0, %c0_0, %c0_1] : memref<1x8x32xbf16, #tpu.memory_space<vmem>>, vector<1x8x32xbf16>
    %1 = vector.shape_cast %0 : vector<1x8x32xbf16> to vector<8x32xbf16>
    %c0_2 = arith.constant 0 : index
    %c0_3 = arith.constant 0 : index
    %2 = vector.load %arg2[%c0_2, %c0_3] : memref<32x96xbf16, #tpu.memory_space<vmem>>, vector<32x96xbf16>
    %cst = arith.constant dense<0.000000e+00> : vector<8x96xf32>
    %3 = tpu.matmul %1, %2, %cst {dimension_numbers = #tpu.dot_dimension_numbers<[1], [0], [0], [1], [0, 0, 1, 1], [], []>} : vector<8x32xbf16>, vector<32x96xbf16>, vector<8x96xf32> -> vector<8x96xf32>
    %4 = arith.truncf %3 : vector<8x96xf32> to vector<8x96xbf16>
    %5 = vector.shape_cast %4 : vector<8x96xbf16> to vector<1x8x96xbf16>
    %c0_4 = arith.constant 0 : index
    %c0_5 = arith.constant 0 : index
    %c0_6 = arith.constant 0 : index
    %6 = vector.load %arg7[%c0_4, %c0_5, %c0_6] : memref<1x8x96xbf16, #tpu.memory_space<vmem>>, vector<1x8x96xbf16>
    tpu.vector_store %arg7[%c0_4, %c0_5, %c0_6], %5 {strides = array<i32>} : memref<1x8x96xbf16, #tpu.memory_space<vmem>>, vector<1x8x96xbf16>,
    %c0_7 = arith.constant 0 : index
    %c0_8 = arith.constant 0 : index
    %c0_9 = arith.constant 0 : index
    %7 = vector.load %arg7[%c0_7, %c0_8, %c0_9] : memref<1x8x96xbf16, #tpu.memory_space<vmem>>, vector<1x8x8xbf16>
    %c0_10 = arith.constant 0 : index
    %c0_11 = arith.constant 0 : index
    %c32 = arith.constant 32 : index
    %8 = vector.load %arg7[%c0_10, %c0_11, %c32] : memref<1x8x96xbf16, #tpu.memory_space<vmem>>, vector<1x8x8xbf16>
    %c0_12 = arith.constant 0 : index
    %c0_13 = arith.constant 0 : index
    %c64 = arith.constant 64 : index
    %9 = vector.load %arg7[%c0_12, %c0_13, %c64] : memref<1x8x96xbf16, #tpu.memory_space<vmem>>, vector<1x8x8xbf16>
    "tpu.trace_start"() <{level = 10 : i32, message = "bnd,bmd->bnm"}> : () -> ()
    %cst_14 = arith.constant dense<0.000000e+00> : vector<1x8x8xf32>
    %10 = tpu.matmul %7, %8, %cst_14 {dimension_numbers = #tpu.dot_dimension_numbers<[2], [2], [1], [1], [0, 0, 0, 1, 1, 1], [0], [0]>} : vector<1x8x8xbf16>, vector<1x8x8xbf16>, vector<1x8x8xf32> -> vector<1x8x8xf32>
    "tpu.trace_stop"() : () -> ()
    %11 = vector.extract_strided_slice %10 {offsets = [0, 0, 0], sizes = [1, 1, 8], strides = [1, 1, 1]} : vector<1x8x8xf32> to vector<1x1x8xf32>
    %c0_15 = arith.constant 0 : index
    %c0_16 = arith.constant 0 : index
    %c0_17 = arith.constant 0 : index
    %12 = vector.load %arg6[%c0_15, %c0_16, %c0_17] : memref<1x4x8xf32, #tpu.memory_space<vmem>>, vector<1x1x8xf32>
    tpu.vector_store %arg6[%c0_15, %c0_16, %c0_17], %11 {strides = array<i32>} : memref<1x4x8xf32, #tpu.memory_space<vmem>>, vector<1x1x8xf32>,
    %cst_18 = arith.constant dense<0xFF800000> : vector<1x8xf32>
    %13 = vector.multi_reduction <maximumf>, %10, %cst_18 [2] : vector<1x8x8xf32> to vector<1x8xf32>
    %14 = vector.shape_cast %13 : vector<1x8xf32> to vector<1x8x1xf32>
    %15 = vector.broadcast %14 : vector<1x8x1xf32> to vector<1x8x8xf32>
    %16 = arith.subf %10, %15 : vector<1x8x8xf32>
    %17 = math.exp %16 : vector<1x8x8xf32>
    %cst_19 = arith.constant dense<0.000000e+00> : vector<1x8xf32>
    %18 = vector.multi_reduction <add>, %17, %cst_19 [2] : vector<1x8x8xf32> to vector<1x8xf32>
    %19 = vector.shape_cast %18 : vector<1x8xf32> to vector<1x8x1xf32>
    %20 = tpu.reciprocal %19 {approx = true} : vector<1x8x1xf32> -> vector<1x8x1xf32>
    %21 = vector.broadcast %20 : vector<1x8x1xf32> to vector<1x8x8xf32>
    %22 = arith.mulf %17, %21 : vector<1x8x8xf32>
    %23 = arith.truncf %22 : vector<1x8x8xf32> to vector<1x8x8xbf16>
    "tpu.trace_start"() <{level = 10 : i32, message = "bnm,bmd->bnd"}> : () -> ()
    %cst_20 = arith.constant dense<0.000000e+00> : vector<1x8x8xf32>
    %24 = tpu.matmul %23, %9, %cst_20 {dimension_numbers = #tpu.dot_dimension_numbers<[2], [1], [1], [2], [0, 0, 0, 1, 1, 2], [0], [0]>} : vector<1x8x8xbf16>, vector<1x8x8xbf16>, vector<1x8x8xf32> -> vector<1x8x8xf32>
    "tpu.trace_stop"() : () -> ()
    %25 = arith.truncf %24 : vector<1x8x8xf32> to vector<1x8x8xbf16>
    %c0_21 = arith.constant 0 : index
    %c0_22 = arith.constant 0 : index
    %c0_23 = arith.constant 0 : index
    %26 = vector.load %arg8[%c0_21, %c0_22, %c0_23] : memref<1x8x32xbf16, #tpu.memory_space<vmem>>, vector<1x8x8xbf16>
    tpu.vector_store %arg8[%c0_21, %c0_22, %c0_23], %25 {strides = array<i32>} : memref<1x8x32xbf16, #tpu.memory_space<vmem>>, vector<1x8x8xbf16>,
    %c0_24 = arith.constant 0 : index
    %c0_25 = arith.constant 0 : index
    %c8 = arith.constant 8 : index
    %27 = vector.load %arg7[%c0_24, %c0_25, %c8] : memref<1x8x96xbf16, #tpu.memory_space<vmem>>, vector<1x8x8xbf16>
    %c0_26 = arith.constant 0 : index
    %c0_27 = arith.constant 0 : index
    %c40 = arith.constant 40 : index
    %28 = vector.load %arg7[%c0_26, %c0_27, %c40] : memref<1x8x96xbf16, #tpu.memory_space<vmem>>, vector<1x8x8xbf16>
    %c0_28 = arith.constant 0 : index
    %c0_29 = arith.constant 0 : index
    %c72 = arith.constant 72 : index
    %29 = vector.load %arg7[%c0_28, %c0_29, %c72] : memref<1x8x96xbf16, #tpu.memory_space<vmem>>, vector<1x8x8xbf16>
    "tpu.trace_start"() <{level = 10 : i32, message = "bnd,bmd->bnm"}> : () -> ()
    %cst_30 = arith.constant dense<0.000000e+00> : vector<1x8x8xf32>
    %30 = tpu.matmul %27, %28, %cst_30 {dimension_numbers = #tpu.dot_dimension_numbers<[2], [2], [1], [1], [0, 0, 0, 1, 1, 1], [0], [0]>} : vector<1x8x8xbf16>, vector<1x8x8xbf16>, vector<1x8x8xf32> -> vector<1x8x8xf32>
    "tpu.trace_stop"() : () -> ()
    %31 = vector.extract_strided_slice %30 {offsets = [0, 0, 0], sizes = [1, 1, 8], strides = [1, 1, 1]} : vector<1x8x8xf32> to vector<1x1x8xf32>
    %c0_31 = arith.constant 0 : index
    %c1 = arith.constant 1 : index
    %c0_32 = arith.constant 0 : index
    %32 = vector.load %arg6[%c0_31, %c1, %c0_32] : memref<1x4x8xf32, #tpu.memory_space<vmem>>, vector<1x1x8xf32>
    tpu.vector_store %arg6[%c0_31, %c1, %c0_32], %31 {strides = array<i32>} : memref<1x4x8xf32, #tpu.memory_space<vmem>>, vector<1x1x8xf32>,
    %cst_33 = arith.constant dense<0xFF800000> : vector<1x8xf32>
    %33 = vector.multi_reduction <maximumf>, %30, %cst_33 [2] : vector<1x8x8xf32> to vector<1x8xf32>
    %34 = vector.shape_cast %33 : vector<1x8xf32> to vector<1x8x1xf32>
    %35 = vector.broadcast %34 : vector<1x8x1xf32> to vector<1x8x8xf32>
    %36 = arith.subf %30, %35 : vector<1x8x8xf32>
    %37 = math.exp %36 : vector<1x8x8xf32>
    %cst_34 = arith.constant dense<0.000000e+00> : vector<1x8xf32>
    %38 = vector.multi_reduction <add>, %37, %cst_34 [2] : vector<1x8x8xf32> to vector<1x8xf32>
    %39 = vector.shape_cast %38 : vector<1x8xf32> to vector<1x8x1xf32>
    %40 = tpu.reciprocal %39 {approx = true} : vector<1x8x1xf32> -> vector<1x8x1xf32>
    %41 = vector.broadcast %40 : vector<1x8x1xf32> to vector<1x8x8xf32>
    %42 = arith.mulf %37, %41 : vector<1x8x8xf32>
    %43 = arith.truncf %42 : vector<1x8x8xf32> to vector<1x8x8xbf16>
    "tpu.trace_start"() <{level = 10 : i32, message = "bnm,bmd->bnd"}> : () -> ()
    %cst_35 = arith.constant dense<0.000000e+00> : vector<1x8x8xf32>
    %44 = tpu.matmul %43, %29, %cst_35 {dimension_numbers = #tpu.dot_dimension_numbers<[2], [1], [1], [2], [0, 0, 0, 1, 1, 2], [0], [0]>} : vector<1x8x8xbf16>, vector<1x8x8xbf16>, vector<1x8x8xf32> -> vector<1x8x8xf32>
    "tpu.trace_stop"() : () -> ()
    %45 = arith.truncf %44 : vector<1x8x8xf32> to vector<1x8x8xbf16>
    %c0_36 = arith.constant 0 : index
    %c0_37 = arith.constant 0 : index
    %c8_38 = arith.constant 8 : index
    %46 = vector.load %arg8[%c0_36, %c0_37, %c8_38] : memref<1x8x32xbf16, #tpu.memory_space<vmem>>, vector<1x8x8xbf16>
    tpu.vector_store %arg8[%c0_36, %c0_37, %c8_38], %45 {strides = array<i32>} : memref<1x8x32xbf16, #tpu.memory_space<vmem>>, vector<1x8x8xbf16>,
    %c0_39 = arith.constant 0 : index
    %c0_40 = arith.constant 0 : index
    %c16 = arith.constant 16 : index
    %47 = vector.load %arg7[%c0_39, %c0_40, %c16] : memref<1x8x96xbf16, #tpu.memory_space<vmem>>, vector<1x8x8xbf16>
    %c0_41 = arith.constant 0 : index
    %c0_42 = arith.constant 0 : index
    %c48 = arith.constant 48 : index
    %48 = vector.load %arg7[%c0_41, %c0_42, %c48] : memref<1x8x96xbf16, #tpu.memory_space<vmem>>, vector<1x8x8xbf16>
    %c0_43 = arith.constant 0 : index
    %c0_44 = arith.constant 0 : index
    %c80 = arith.constant 80 : index
    %49 = vector.load %arg7[%c0_43, %c0_44, %c80] : memref<1x8x96xbf16, #tpu.memory_space<vmem>>, vector<1x8x8xbf16>
    "tpu.trace_start"() <{level = 10 : i32, message = "bnd,bmd->bnm"}> : () -> ()
    %cst_45 = arith.constant dense<0.000000e+00> : vector<1x8x8xf32>
    %50 = tpu.matmul %47, %48, %cst_45 {dimension_numbers = #tpu.dot_dimension_numbers<[2], [2], [1], [1], [0, 0, 0, 1, 1, 1], [0], [0]>} : vector<1x8x8xbf16>, vector<1x8x8xbf16>, vector<1x8x8xf32> -> vector<1x8x8xf32>
    "tpu.trace_stop"() : () -> ()
    %51 = vector.extract_strided_slice %50 {offsets = [0, 0, 0], sizes = [1, 1, 8], strides = [1, 1, 1]} : vector<1x8x8xf32> to vector<1x1x8xf32>
    %c0_46 = arith.constant 0 : index
    %c2 = arith.constant 2 : index
    %c0_47 = arith.constant 0 : index
    %52 = vector.load %arg6[%c0_46, %c2, %c0_47] : memref<1x4x8xf32, #tpu.memory_space<vmem>>, vector<1x1x8xf32>
    tpu.vector_store %arg6[%c0_46, %c2, %c0_47], %51 {strides = array<i32>} : memref<1x4x8xf32, #tpu.memory_space<vmem>>, vector<1x1x8xf32>,
    %cst_48 = arith.constant dense<0xFF800000> : vector<1x8xf32>
    %53 = vector.multi_reduction <maximumf>, %50, %cst_48 [2] : vector<1x8x8xf32> to vector<1x8xf32>
    %54 = vector.shape_cast %53 : vector<1x8xf32> to vector<1x8x1xf32>
    %55 = vector.broadcast %54 : vector<1x8x1xf32> to vector<1x8x8xf32>
    %56 = arith.subf %50, %55 : vector<1x8x8xf32>
    %57 = math.exp %56 : vector<1x8x8xf32>
    %cst_49 = arith.constant dense<0.000000e+00> : vector<1x8xf32>
    %58 = vector.multi_reduction <add>, %57, %cst_49 [2] : vector<1x8x8xf32> to vector<1x8xf32>
    %59 = vector.shape_cast %58 : vector<1x8xf32> to vector<1x8x1xf32>
    %60 = tpu.reciprocal %59 {approx = true} : vector<1x8x1xf32> -> vector<1x8x1xf32>
    %61 = vector.broadcast %60 : vector<1x8x1xf32> to vector<1x8x8xf32>
    %62 = arith.mulf %57, %61 : vector<1x8x8xf32>
    %63 = arith.truncf %62 : vector<1x8x8xf32> to vector<1x8x8xbf16>
    "tpu.trace_start"() <{level = 10 : i32, message = "bnm,bmd->bnd"}> : () -> ()
    %cst_50 = arith.constant dense<0.000000e+00> : vector<1x8x8xf32>
    %64 = tpu.matmul %63, %49, %cst_50 {dimension_numbers = #tpu.dot_dimension_numbers<[2], [1], [1], [2], [0, 0, 0, 1, 1, 2], [0], [0]>} : vector<1x8x8xbf16>, vector<1x8x8xbf16>, vector<1x8x8xf32> -> vector<1x8x8xf32>
    "tpu.trace_stop"() : () -> ()
    %65 = arith.truncf %64 : vector<1x8x8xf32> to vector<1x8x8xbf16>
    %c0_51 = arith.constant 0 : index
    %c0_52 = arith.constant 0 : index
    %c16_53 = arith.constant 16 : index
    %66 = vector.load %arg8[%c0_51, %c0_52, %c16_53] : memref<1x8x32xbf16, #tpu.memory_space<vmem>>, vector<1x8x8xbf16>
    tpu.vector_store %arg8[%c0_51, %c0_52, %c16_53], %65 {strides = array<i32>} : memref<1x8x32xbf16, #tpu.memory_space<vmem>>, vector<1x8x8xbf16>,
    %c0_54 = arith.constant 0 : index
    %c0_55 = arith.constant 0 : index
    %c24 = arith.constant 24 : index
    %67 = vector.load %arg7[%c0_54, %c0_55, %c24] : memref<1x8x96xbf16, #tpu.memory_space<vmem>>, vector<1x8x8xbf16>
    %c0_56 = arith.constant 0 : index
    %c0_57 = arith.constant 0 : index
    %c56 = arith.constant 56 : index
    %68 = vector.load %arg7[%c0_56, %c0_57, %c56] : memref<1x8x96xbf16, #tpu.memory_space<vmem>>, vector<1x8x8xbf16>
    %c0_58 = arith.constant 0 : index
    %c0_59 = arith.constant 0 : index
    %c88 = arith.constant 88 : index
    %69 = vector.load %arg7[%c0_58, %c0_59, %c88] : memref<1x8x96xbf16, #tpu.memory_space<vmem>>, vector<1x8x8xbf16>
    "tpu.trace_start"() <{level = 10 : i32, message = "bnd,bmd->bnm"}> : () -> ()
    %cst_60 = arith.constant dense<0.000000e+00> : vector<1x8x8xf32>
    %70 = tpu.matmul %67, %68, %cst_60 {dimension_numbers = #tpu.dot_dimension_numbers<[2], [2], [1], [1], [0, 0, 0, 1, 1, 1], [0], [0]>} : vector<1x8x8xbf16>, vector<1x8x8xbf16>, vector<1x8x8xf32> -> vector<1x8x8xf32>
    "tpu.trace_stop"() : () -> ()
    %71 = vector.extract_strided_slice %70 {offsets = [0, 0, 0], sizes = [1, 1, 8], strides = [1, 1, 1]} : vector<1x8x8xf32> to vector<1x1x8xf32>
    %c0_61 = arith.constant 0 : index
    %c3 = arith.constant 3 : index
    %c0_62 = arith.constant 0 : index
    %72 = vector.load %arg6[%c0_61, %c3, %c0_62] : memref<1x4x8xf32, #tpu.memory_space<vmem>>, vector<1x1x8xf32>
    tpu.vector_store %arg6[%c0_61, %c3, %c0_62], %71 {strides = array<i32>} : memref<1x4x8xf32, #tpu.memory_space<vmem>>, vector<1x1x8xf32>,
    %cst_63 = arith.constant dense<0xFF800000> : vector<1x8xf32>
    %73 = vector.multi_reduction <maximumf>, %70, %cst_63 [2] : vector<1x8x8xf32> to vector<1x8xf32>
    %74 = vector.shape_cast %73 : vector<1x8xf32> to vector<1x8x1xf32>
    %75 = vector.broadcast %74 : vector<1x8x1xf32> to vector<1x8x8xf32>
    %76 = arith.subf %70, %75 : vector<1x8x8xf32>
    %77 = math.exp %76 : vector<1x8x8xf32>
    %cst_64 = arith.constant dense<0.000000e+00> : vector<1x8xf32>
    %78 = vector.multi_reduction <add>, %77, %cst_64 [2] : vector<1x8x8xf32> to vector<1x8xf32>
    %79 = vector.shape_cast %78 : vector<1x8xf32> to vector<1x8x1xf32>
    %80 = tpu.reciprocal %79 {approx = true} : vector<1x8x1xf32> -> vector<1x8x1xf32>
    %81 = vector.broadcast %80 : vector<1x8x1xf32> to vector<1x8x8xf32>
    %82 = arith.mulf %77, %81 : vector<1x8x8xf32>
    %83 = arith.truncf %82 : vector<1x8x8xf32> to vector<1x8x8xbf16>
    "tpu.trace_start"() <{level = 10 : i32, message = "bnm,bmd->bnd"}> : () -> ()
    %cst_65 = arith.constant dense<0.000000e+00> : vector<1x8x8xf32>
    %84 = tpu.matmul %83, %69, %cst_65 {dimension_numbers = #tpu.dot_dimension_numbers<[2], [1], [1], [2], [0, 0, 0, 1, 1, 2], [0], [0]>} : vector<1x8x8xbf16>, vector<1x8x8xbf16>, vector<1x8x8xf32> -> vector<1x8x8xf32>
    "tpu.trace_stop"() : () -> ()
    %85 = arith.truncf %84 : vector<1x8x8xf32> to vector<1x8x8xbf16>
    %c0_66 = arith.constant 0 : index
    %c0_67 = arith.constant 0 : index
    %c24_68 = arith.constant 24 : index
    %86 = vector.load %arg8[%c0_66, %c0_67, %c24_68] : memref<1x8x32xbf16, #tpu.memory_space<vmem>>, vector<1x8x8xbf16>
    tpu.vector_store %arg8[%c0_66, %c0_67, %c24_68], %85 {strides = array<i32>} : memref<1x8x32xbf16, #tpu.memory_space<vmem>>, vector<1x8x8xbf16>,
    %c0_69 = arith.constant 0 : index
    %c0_70 = arith.constant 0 : index
    %c0_71 = arith.constant 0 : index
    %87 = vector.load %arg8[%c0_69, %c0_70, %c0_71] : memref<1x8x32xbf16, #tpu.memory_space<vmem>>, vector<1x8x32xbf16>
    %88 = vector.shape_cast %87 : vector<1x8x32xbf16> to vector<8x32xbf16>
    %c0_72 = arith.constant 0 : index
    %c0_73 = arith.constant 0 : index
    %89 = vector.load %arg3[%c0_72, %c0_73] : memref<32x32xbf16, #tpu.memory_space<vmem>>, vector<32x32xbf16>
    %cst_74 = arith.constant dense<0.000000e+00> : vector<8x32xf32>
    %90 = tpu.matmul %88, %89, %cst_74 {dimension_numbers = #tpu.dot_dimension_numbers<[1], [0], [0], [1], [0, 0, 1, 1], [], []>} : vector<8x32xbf16>, vector<32x32xbf16>, vector<8x32xf32> -> vector<8x32xf32>
    %c0_75 = arith.constant 0 : index
    %c0_76 = arith.constant 0 : index
    %91 = vector.load %arg4[%c0_75, %c0_76] : memref<1x32xf32, #tpu.memory_space<vmem>>, vector<1x32xf32>
    %92 = vector.broadcast %91 : vector<1x32xf32> to vector<8x32xf32>
    %93 = arith.addf %90, %92 : vector<8x32xf32>
    %94 = vector.shape_cast %93 : vector<8x32xf32> to vector<1x8x32xf32>
    %c0_77 = arith.constant 0 : index
    %c0_78 = arith.constant 0 : index
    %c0_79 = arith.constant 0 : index
    %95 = vector.load %arg5[%c0_77, %c0_78, %c0_79] : memref<1x8x32xf32, #tpu.memory_space<vmem>>, vector<1x8x32xf32>
    tpu.vector_store %arg5[%c0_77, %c0_78, %c0_79], %94 {strides = array<i32>} : memref<1x8x32xf32, #tpu.memory_space<vmem>>, vector<1x8x32xf32>,
    return
  }
  func.func @transform_0(%arg0: i32) -> (i32, i32, i32) {
    %c0_i32 = arith.constant 0 : i32
    %c0_i32_0 = arith.constant 0 : i32
    %c0_i32_1 = arith.constant 0 : i32
    return %arg0, %c0_i32, %c0_i32_0 : i32, i32, i32
  }
  func.func @transform_1(%arg0: i32) -> (i32, i32) {
    %c0_i32 = arith.constant 0 : i32
    %c0_i32_0 = arith.constant 0 : i32
    %c0_i32_1 = arith.constant 0 : i32
    return %c0_i32, %c0_i32_0 : i32, i32
  }
  func.func @transform_2(%arg0: i32) -> (i32, i32) {
    %c0_i32 = arith.constant 0 : i32
    %c0_i32_0 = arith.constant 0 : i32
    %c0_i32_1 = arith.constant 0 : i32
    return %c0_i32, %c0_i32_0 : i32, i32
  }
  func.func @transform_3(%arg0: i32) -> (i32, i32) {
    %c0_i32 = arith.constant 0 : i32
    %c0_i32_0 = arith.constant 0 : i32
    %c0_i32_1 = arith.constant 0 : i32
    return %c0_i32, %c0_i32_0 : i32, i32
  }
  func.func @transform_4(%arg0: i32) -> (i32, i32, i32) {
    %c0_i32 = arith.constant 0 : i32
    %c0_i32_0 = arith.constant 0 : i32
    %c0_i32_1 = arith.constant 0 : i32
    return %arg0, %c0_i32, %c0_i32_0 : i32, i32, i32
  }
  func.func @transform_5(%arg0: i32) -> (i32, i32, i32) {
    %c0_i32 = arith.constant 0 : i32
    %c0_i32_0 = arith.constant 0 : i32
    %c0_i32_1 = arith.constant 0 : i32
    return %arg0, %c0_i32, %c0_i32_0 : i32, i32, i32
  }
}

module attributes {stable_mosaic.version = 11 : i64} {
  func.func @_attention_kernel(%arg0: i32, %arg1: memref<1x8x32xbf16, #tpu.memory_space<vmem>>, %arg2: memref<32x96xbf16, #tpu.memory_space<vmem>>, %arg3: memref<32x32xbf16, #tpu.memory_space<vmem>>, %arg4: memref<1x32xf32, #tpu.memory_space<vmem>>, %arg5: memref<1x8x32xf32, #tpu.memory_space<vmem>>, %arg6: memref<1x4x8xf32, #tpu.memory_space<vmem>>, %arg7: memref<1x8x96xbf16, #tpu.memory_space<vmem>>, %arg8: memref<1x8x32xbf16, #tpu.memory_space<vmem>>) attributes {dimension_semantics = [#tpu.dimension_semantics<parallel>], iteration_bounds = array<i64: 2>, scalar_prefetch = 0 : i64, scratch_operands = 2 : i64, tpu.core_type = #tpu.core_type<tc>, window_params = [{transform_indices = @transform_0, window_bounds = array<i64: 1, 8, 32>}, {pipeline_mode = #tpu.pipeline_mode<synchronous>, transform_indices = @transform_1, window_bounds = array<i64: 32, 96>}, {pipeline_mode = #tpu.pipeline_mode<synchronous>, transform_indices = @transform_2, window_bounds = array<i64: 32, 32>}, {pipeline_mode = #tpu.pipeline_mode<synchronous>, transform_indices = @transform_3, window_bounds = array<i64: 1, 32>}, {transform_indices = @transform_4, window_bounds = array<i64: 1, 8, 32>}, {transform_indices = @transform_5, window_bounds = array<i64: 1, 4, 8>}]} {
    %c0 = arith.constant 0 : index
    %c0_0 = arith.constant 0 : index
    %c0_1 = arith.constant 0 : index
    %0 = vector.load %arg1[%c0, %c0_0, %c0_1] : memref<1x8x32xbf16, #tpu.memory_space<vmem>>, vector<1x8x32xbf16>
    %1 = vector.shape_cast %0 : vector<1x8x32xbf16> to vector<8x32xbf16>
    %c0_2 = arith.constant 0 : index
    %c0_3 = arith.constant 0 : index
    %2 = vector.load %arg2[%c0_2, %c0_3] : memref<32x96xbf16, #tpu.memory_space<vmem>>, vector<32x96xbf16>
    %cst = arith.constant dense<0.000000e+00> : vector<8x96xf32>
    %3 = tpu.matmul %1, %2, %cst {dimension_numbers = #tpu.dot_dimension_numbers<[1], [0], [0], [1], [0, 0, 1, 1], [], []>} : vector<8x32xbf16>, vector<32x96xbf16>, vector<8x96xf32> -> vector<8x96xf32>
    %4 = arith.truncf %3 : vector<8x96xf32> to vector<8x96xbf16>
    %5 = vector.shape_cast %4 : vector<8x96xbf16> to vector<1x8x96xbf16>
    %c0_4 = arith.constant 0 : index
    %c0_5 = arith.constant 0 : index
    %c0_6 = arith.constant 0 : index
    %6 = vector.load %arg7[%c0_4, %c0_5, %c0_6] : memref<1x8x96xbf16, #tpu.memory_space<vmem>>, vector<1x8x96xbf16>
    tpu.vector_store %arg7[%c0_4, %c0_5, %c0_6], %5 {strides = array<i32>} : memref<1x8x96xbf16, #tpu.memory_space<vmem>>, vector<1x8x96xbf16>,
    %c0_7 = arith.constant 0 : index
    %c0_8 = arith.constant 0 : index
    %c0_9 = arith.constant 0 : index
    %7 = vector.load %arg7[%c0_7, %c0_8, %c0_9] : memref<1x8x96xbf16, #tpu.memory_space<vmem>>, vector<1x8x8xbf16>
    %c0_10 = arith.constant 0 : index
    %c0_11 = arith.constant 0 : index
    %c32 = arith.constant 32 : index
    %8 = vector.load %arg7[%c0_10, %c0_11, %c32] : memref<1x8x96xbf16, #tpu.memory_space<vmem>>, vector<1x8x8xbf16>
    %c0_12 = arith.constant 0 : index
    %c0_13 = arith.constant 0 : index
    %c64 = arith.constant 64 : index
    %9 = vector.load %arg7[%c0_12, %c0_13, %c64] : memref<1x8x96xbf16, #tpu.memory_space<vmem>>, vector<1x8x8xbf16>
    "tpu.trace_start"() <{level = 10 : i32, message = "bnd,bmd->bnm"}> : () -> ()
    %cst_14 = arith.constant dense<0.000000e+00> : vector<1x8x8xf32>
    %10 = tpu.matmul %7, %8, %cst_14 {dimension_numbers = #tpu.dot_dimension_numbers<[2], [2], [1], [1], [0, 0, 0, 1, 1, 1], [0], [0]>} : vector<1x8x8xbf16>, vector<1x8x8xbf16>, vector<1x8x8xf32> -> vector<1x8x8xf32>
    "tpu.trace_stop"() : () -> ()
    %11 = vector.extract_strided_slice %10 {offsets = [0, 0, 0], sizes = [1, 1, 8], strides = [1, 1, 1]} : vector<1x8x8xf32> to vector<1x1x8xf32>
    %c0_15 = arith.constant 0 : index
    %c0_16 = arith.constant 0 : index
    %c0_17 = arith.constant 0 : index
    %12 = vector.load %arg6[%c0_15, %c0_16, %c0_17] : memref<1x4x8xf32, #tpu.memory_space<vmem>>, vector<1x1x8xf32>
    tpu.vector_store %arg6[%c0_15, %c0_16, %c0_17], %11 {strides = array<i32>} : memref<1x4x8xf32, #tpu.memory_space<vmem>>, vector<1x1x8xf32>,
    %cst_18 = arith.constant dense<0xFF800000> : vector<1x8xf32>
    %13 = vector.multi_reduction <maximumf>, %10, %cst_18 [2] : vector<1x8x8xf32> to vector<1x8xf32>
    %14 = vector.shape_cast %13 : vector<1x8xf32> to vector<1x8x1xf32>
    %15 = vector.broadcast %14 : vector<1x8x1xf32> to vector<1x8x8xf32>
    %16 = arith.subf %10, %15 : vector<1x8x8xf32>
    %17 = math.exp %16 : vector<1x8x8xf32>
    %cst_19 = arith.constant dense<0.000000e+00> : vector<1x8xf32>
    %18 = vector.multi_reduction <add>, %17, %cst_19 [2] : vector<1x8x8xf32> to vector<1x8xf32>
    %19 = vector.shape_cast %18 : vector<1x8xf32> to vector<1x8x1xf32>
    %20 = tpu.reciprocal %19 {approx = true} : vector<1x8x1xf32> -> vector<1x8x1xf32>
    %21 = vector.broadcast %20 : vector<1x8x1xf32> to vector<1x8x8xf32>
    %22 = arith.mulf %17, %21 : vector<1x8x8xf32>
    %23 = arith.truncf %22 : vector<1x8x8xf32> to vector<1x8x8xbf16>
    "tpu.trace_start"() <{level = 10 : i32, message = "bnm,bmd->bnd"}> : () -> ()
    %cst_20 = arith.constant dense<0.000000e+00> : vector<1x8x8xf32>
    %24 = tpu.matmul %23, %9, %cst_20 {dimension_numbers = #tpu.dot_dimension_numbers<[2], [1], [1], [2], [0, 0, 0, 1, 1, 2], [0], [0]>} : vector<1x8x8xbf16>, vector<1x8x8xbf16>, vector<1x8x8xf32> -> vector<1x8x8xf32>
    "tpu.trace_stop"() : () -> ()
    %25 = arith.truncf %24 : vector<1x8x8xf32> to vector<1x8x8xbf16>
    %c0_21 = arith.constant 0 : index
    %c0_22 = arith.constant 0 : index
    %c0_23 = arith.constant 0 : index
    %26 = vector.load %arg8[%c0_21, %c0_22, %c0_23] : memref<1x8x32xbf16, #tpu.memory_space<vmem>>, vector<1x8x8xbf16>
    tpu.vector_store %arg8[%c0_21, %c0_22, %c0_23], %25 {strides = array<i32>} : memref<1x8x32xbf16, #tpu.memory_space<vmem>>, vector<1x8x8xbf16>,
    %c0_24 = arith.constant 0 : index
    %c0_25 = arith.constant 0 : index
    %c8 = arith.constant 8 : index
    %27 = vector.load %arg7[%c0_24, %c0_25, %c8] : memref<1x8x96xbf16, #tpu.memory_space<vmem>>, vector<1x8x8xbf16>
    %c0_26 = arith.constant 0 : index
    %c0_27 = arith.constant 0 : index
    %c40 = arith.constant 40 : index
    %28 = vector.load %arg7[%c0_26, %c0_27, %c40] : memref<1x8x96xbf16, #tpu.memory_space<vmem>>, vector<1x8x8xbf16>
    %c0_28 = arith.constant 0 : index
    %c0_29 = arith.constant 0 : index
    %c72 = arith.constant 72 : index
    %29 = vector.load %arg7[%c0_28, %c0_29, %c72] : memref<1x8x96xbf16, #tpu.memory_space<vmem>>, vector<1x8x8xbf16>
    "tpu.trace_start"() <{level = 10 : i32, message = "bnd,bmd->bnm"}> : () -> ()
    %cst_30 = arith.constant dense<0.000000e+00> : vector<1x8x8xf32>
    %30 = tpu.matmul %27, %28, %cst_30 {dimension_numbers = #tpu.dot_dimension_numbers<[2], [2], [1], [1], [0, 0, 0, 1, 1, 1], [0], [0]>} : vector<1x8x8xbf16>, vector<1x8x8xbf16>, vector<1x8x8xf32> -> vector<1x8x8xf32>
    "tpu.trace_stop"() : () -> ()
    %31 = vector.extract_strided_slice %30 {offsets = [0, 0, 0], sizes = [1, 1, 8], strides = [1, 1, 1]} : vector<1x8x8xf32> to vector<1x1x8xf32>
    %c0_31 = arith.constant 0 : index
    %c1 = arith.constant 1 : index
    %c0_32 = arith.constant 0 : index
    %32 = vector.load %arg6[%c0_31, %c1, %c0_32] : memref<1x4x8xf32, #tpu.memory_space<vmem>>, vector<1x1x8xf32>
    tpu.vector_store %arg6[%c0_31, %c1, %c0_32], %31 {strides = array<i32>} : memref<1x4x8xf32, #tpu.memory_space<vmem>>, vector<1x1x8xf32>,
    %cst_33 = arith.constant dense<0xFF800000> : vector<1x8xf32>
    %33 = vector.multi_reduction <maximumf>, %30, %cst_33 [2] : vector<1x8x8xf32> to vector<1x8xf32>
    %34 = vector.shape_cast %33 : vector<1x8xf32> to vector<1x8x1xf32>
    %35 = vector.broadcast %34 : vector<1x8x1xf32> to vector<1x8x8xf32>
    %36 = arith.subf %30, %35 : vector<1x8x8xf32>
    %37 = math.exp %36 : vector<1x8x8xf32>
    %cst_34 = arith.constant dense<0.000000e+00> : vector<1x8xf32>
    %38 = vector.multi_reduction <add>, %37, %cst_34 [2] : vector<1x8x8xf32> to vector<1x8xf32>
    %39 = vector.shape_cast %38 : vector<1x8xf32> to vector<1x8x1xf32>
    %40 = tpu.reciprocal %39 {approx = true} : vector<1x8x1xf32> -> vector<1x8x1xf32>
    %41 = vector.broadcast %40 : vector<1x8x1xf32> to vector<1x8x8xf32>
    %42 = arith.mulf %37, %41 : vector<1x8x8xf32>
    %43 = arith.truncf %42 : vector<1x8x8xf32> to vector<1x8x8xbf16>
    "tpu.trace_start"() <{level = 10 : i32, message = "bnm,bmd->bnd"}> : () -> ()
    %cst_35 = arith.constant dense<0.000000e+00> : vector<1x8x8xf32>
    %44 = tpu.matmul %43, %29, %cst_35 {dimension_numbers = #tpu.dot_dimension_numbers<[2], [1], [1], [2], [0, 0, 0, 1, 1, 2], [0], [0]>} : vector<1x8x8xbf16>, vector<1x8x8xbf16>, vector<1x8x8xf32> -> vector<1x8x8xf32>
    "tpu.trace_stop"() : () -> ()
    %45 = arith.truncf %44 : vector<1x8x8xf32> to vector<1x8x8xbf16>
    %c0_36 = arith.constant 0 : index
    %c0_37 = arith.constant 0 : index
    %c8_38 = arith.constant 8 : index
    %46 = vector.load %arg8[%c0_36, %c0_37, %c8_38] : memref<1x8x32xbf16, #tpu.memory_space<vmem>>, vector<1x8x8xbf16>
    tpu.vector_store %arg8[%c0_36, %c0_37, %c8_38], %45 {strides = array<i32>} : memref<1x8x32xbf16, #tpu.memory_space<vmem>>, vector<1x8x8xbf16>,
    %c0_39 = arith.constant 0 : index
    %c0_40 = arith.constant 0 : index
    %c16 = arith.constant 16 : index
    %47 = vector.load %arg7[%c0_39, %c0_40, %c16] : memref<1x8x96xbf16, #tpu.memory_space<vmem>>, vector<1x8x8xbf16>
    %c0_41 = arith.constant 0 : index
    %c0_42 = arith.constant 0 : index
    %c48 = arith.constant 48 : index
    %48 = vector.load %arg7[%c0_41, %c0_42, %c48] : memref<1x8x96xbf16, #tpu.memory_space<vmem>>, vector<1x8x8xbf16>
    %c0_43 = arith.constant 0 : index
    %c0_44 = arith.constant 0 : index
    %c80 = arith.constant 80 : index
    %49 = vector.load %arg7[%c0_43, %c0_44, %c80] : memref<1x8x96xbf16, #tpu.memory_space<vmem>>, vector<1x8x8xbf16>
    "tpu.trace_start"() <{level = 10 : i32, message = "bnd,bmd->bnm"}> : () -> ()
    %cst_45 = arith.constant dense<0.000000e+00> : vector<1x8x8xf32>
    %50 = tpu.matmul %47, %48, %cst_45 {dimension_numbers = #tpu.dot_dimension_numbers<[2], [2], [1], [1], [0, 0, 0, 1, 1, 1], [0], [0]>} : vector<1x8x8xbf16>, vector<1x8x8xbf16>, vector<1x8x8xf32> -> vector<1x8x8xf32>
    "tpu.trace_stop"() : () -> ()
    %51 = vector.extract_strided_slice %50 {offsets = [0, 0, 0], sizes = [1, 1, 8], strides = [1, 1, 1]} : vector<1x8x8xf32> to vector<1x1x8xf32>
    %c0_46 = arith.constant 0 : index
    %c2 = arith.constant 2 : index
    %c0_47 = arith.constant 0 : index
    %52 = vector.load %arg6[%c0_46, %c2, %c0_47] : memref<1x4x8xf32, #tpu.memory_space<vmem>>, vector<1x1x8xf32>
    tpu.vector_store %arg6[%c0_46, %c2, %c0_47], %51 {strides = array<i32>} : memref<1x4x8xf32, #tpu.memory_space<vmem>>, vector<1x1x8xf32>,
    %cst_48 = arith.constant dense<0xFF800000> : vector<1x8xf32>
    %53 = vector.multi_reduction <maximumf>, %50, %cst_48 [2] : vector<1x8x8xf32> to vector<1x8xf32>
    %54 = vector.shape_cast %53 : vector<1x8xf32> to vector<1x8x1xf32>
    %55 = vector.broadcast %54 : vector<1x8x1xf32> to vector<1x8x8xf32>
    %56 = arith.subf %50, %55 : vector<1x8x8xf32>
    %57 = math.exp %56 : vector<1x8x8xf32>
    %cst_49 = arith.constant dense<0.000000e+00> : vector<1x8xf32>
    %58 = vector.multi_reduction <add>, %57, %cst_49 [2] : vector<1x8x8xf32> to vector<1x8xf32>
    %59 = vector.shape_cast %58 : vector<1x8xf32> to vector<1x8x1xf32>
    %60 = tpu.reciprocal %59 {approx = true} : vector<1x8x1xf32> -> vector<1x8x1xf32>
    %61 = vector.broadcast %60 : vector<1x8x1xf32> to vector<1x8x8xf32>
    %62 = arith.mulf %57, %61 : vector<1x8x8xf32>
    %63 = arith.truncf %62 : vector<1x8x8xf32> to vector<1x8x8xbf16>
    "tpu.trace_start"() <{level = 10 : i32, message = "bnm,bmd->bnd"}> : () -> ()
    %cst_50 = arith.constant dense<0.000000e+00> : vector<1x8x8xf32>
    %64 = tpu.matmul %63, %49, %cst_50 {dimension_numbers = #tpu.dot_dimension_numbers<[2], [1], [1], [2], [0, 0, 0, 1, 1, 2], [0], [0]>} : vector<1x8x8xbf16>, vector<1x8x8xbf16>, vector<1x8x8xf32> -> vector<1x8x8xf32>
    "tpu.trace_stop"() : () -> ()
    %65 = arith.truncf %64 : vector<1x8x8xf32> to vector<1x8x8xbf16>
    %c0_51 = arith.constant 0 : index
    %c0_52 = arith.constant 0 : index
    %c16_53 = arith.constant 16 : index
    %66 = vector.load %arg8[%c0_51, %c0_52, %c16_53] : memref<1x8x32xbf16, #tpu.memory_space<vmem>>, vector<1x8x8xbf16>
    tpu.vector_store %arg8[%c0_51, %c0_52, %c16_53], %65 {strides = array<i32>} : memref<1x8x32xbf16, #tpu.memory_space<vmem>>, vector<1x8x8xbf16>,
    %c0_54 = arith.constant 0 : index
    %c0_55 = arith.constant 0 : index
    %c24 = arith.constant 24 : index
    %67 = vector.load %arg7[%c0_54, %c0_55, %c24] : memref<1x8x96xbf16, #tpu.memory_space<vmem>>, vector<1x8x8xbf16>
    %c0_56 = arith.constant 0 : index
    %c0_57 = arith.constant 0 : index
    %c56 = arith.constant 56 : index
    %68 = vector.load %arg7[%c0_56, %c0_57, %c56] : memref<1x8x96xbf16, #tpu.memory_space<vmem>>, vector<1x8x8xbf16>
    %c0_58 = arith.constant 0 : index
    %c0_59 = arith.constant 0 : index
    %c88 = arith.constant 88 : index
    %69 = vector.load %arg7[%c0_58, %c0_59, %c88] : memref<1x8x96xbf16, #tpu.memory_space<vmem>>, vector<1x8x8xbf16>
    "tpu.trace_start"() <{level = 10 : i32, message = "bnd,bmd->bnm"}> : () -> ()
    %cst_60 = arith.constant dense<0.000000e+00> : vector<1x8x8xf32>
    %70 = tpu.matmul %67, %68, %cst_60 {dimension_numbers = #tpu.dot_dimension_numbers<[2], [2], [1], [1], [0, 0, 0, 1, 1, 1], [0], [0]>} : vector<1x8x8xbf16>, vector<1x8x8xbf16>, vector<1x8x8xf32> -> vector<1x8x8xf32>
    "tpu.trace_stop"() : () -> ()
    %71 = vector.extract_strided_slice %70 {offsets = [0, 0, 0], sizes = [1, 1, 8], strides = [1, 1, 1]} : vector<1x8x8xf32> to vector<1x1x8xf32>
    %c0_61 = arith.constant 0 : index
    %c3 = arith.constant 3 : index
    %c0_62 = arith.constant 0 : index
    %72 = vector.load %arg6[%c0_61, %c3, %c0_62] : memref<1x4x8xf32, #tpu.memory_space<vmem>>, vector<1x1x8xf32>
    tpu.vector_store %arg6[%c0_61, %c3, %c0_62], %71 {strides = array<i32>} : memref<1x4x8xf32, #tpu.memory_space<vmem>>, vector<1x1x8xf32>,
    %cst_63 = arith.constant dense<0xFF800000> : vector<1x8xf32>
    %73 = vector.multi_reduction <maximumf>, %70, %cst_63 [2] : vector<1x8x8xf32> to vector<1x8xf32>
    %74 = vector.shape_cast %73 : vector<1x8xf32> to vector<1x8x1xf32>
    %75 = vector.broadcast %74 : vector<1x8x1xf32> to vector<1x8x8xf32>
    %76 = arith.subf %70, %75 : vector<1x8x8xf32>
    %77 = math.exp %76 : vector<1x8x8xf32>
    %cst_64 = arith.constant dense<0.000000e+00> : vector<1x8xf32>
    %78 = vector.multi_reduction <add>, %77, %cst_64 [2] : vector<1x8x8xf32> to vector<1x8xf32>
    %79 = vector.shape_cast %78 : vector<1x8xf32> to vector<1x8x1xf32>
    %80 = tpu.reciprocal %79 {approx = true} : vector<1x8x1xf32> -> vector<1x8x1xf32>
    %81 = vector.broadcast %80 : vector<1x8x1xf32> to vector<1x8x8xf32>
    %82 = arith.mulf %77, %81 : vector<1x8x8xf32>
    %83 = arith.truncf %82 : vector<1x8x8xf32> to vector<1x8x8xbf16>
    "tpu.trace_start"() <{level = 10 : i32, message = "bnm,bmd->bnd"}> : () -> ()
    %cst_65 = arith.constant dense<0.000000e+00> : vector<1x8x8xf32>
    %84 = tpu.matmul %83, %69, %cst_65 {dimension_numbers = #tpu.dot_dimension_numbers<[2], [1], [1], [2], [0, 0, 0, 1, 1, 2], [0], [0]>} : vector<1x8x8xbf16>, vector<1x8x8xbf16>, vector<1x8x8xf32> -> vector<1x8x8xf32>
    "tpu.trace_stop"() : () -> ()
    %85 = arith.truncf %84 : vector<1x8x8xf32> to vector<1x8x8xbf16>
    %c0_66 = arith.constant 0 : index
    %c0_67 = arith.constant 0 : index
    %c24_68 = arith.constant 24 : index
    %86 = vector.load %arg8[%c0_66, %c0_67, %c24_68] : memref<1x8x32xbf16, #tpu.memory_space<vmem>>, vector<1x8x8xbf16>
    tpu.vector_store %arg8[%c0_66, %c0_67, %c24_68], %85 {strides = array<i32>} : memref<1x8x32xbf16, #tpu.memory_space<vmem>>, vector<1x8x8xbf16>,
    %c0_69 = arith.constant 0 : index
    %c0_70 = arith.constant 0 : index
    %c0_71 = arith.constant 0 : index
    %87 = vector.load %arg8[%c0_69, %c0_70, %c0_71] : memref<1x8x32xbf16, #tpu.memory_space<vmem>>, vector<1x8x32xbf16>
    %88 = vector.shape_cast %87 : vector<1x8x32xbf16> to vector<8x32xbf16>
    %c0_72 = arith.constant 0 : index
    %c0_73 = arith.constant 0 : index
    %89 = vector.load %arg3[%c0_72, %c0_73] : memref<32x32xbf16, #tpu.memory_space<vmem>>, vector<32x32xbf16>
    %cst_74 = arith.constant dense<0.000000e+00> : vector<8x32xf32>
    %90 = tpu.matmul %88, %89, %cst_74 {dimension_numbers = #tpu.dot_dimension_numbers<[1], [0], [0], [1], [0, 0, 1, 1], [], []>} : vector<8x32xbf16>, vector<32x32xbf16>, vector<8x32xf32> -> vector<8x32xf32>
    %c0_75 = arith.constant 0 : index
    %c0_76 = arith.constant 0 : index
    %91 = vector.load %arg4[%c0_75, %c0_76] : memref<1x32xf32, #tpu.memory_space<vmem>>, vector<1x32xf32>
    %92 = vector.broadcast %91 : vector<1x32xf32> to vector<8x32xf32>
    %93 = arith.addf %90, %92 : vector<8x32xf32>
    %94 = vector.shape_cast %93 : vector<8x32xf32> to vector<1x8x32xf32>
    %c0_77 = arith.constant 0 : index
    %c0_78 = arith.constant 0 : index
    %c0_79 = arith.constant 0 : index
    %95 = vector.load %arg5[%c0_77, %c0_78, %c0_79] : memref<1x8x32xf32, #tpu.memory_space<vmem>>, vector<1x8x32xf32>
    tpu.vector_store %arg5[%c0_77, %c0_78, %c0_79], %94 {strides = array<i32>} : memref<1x8x32xf32, #tpu.memory_space<vmem>>, vector<1x8x32xf32>,
    return
  }
  func.func @transform_0(%arg0: i32) -> (i32, i32, i32) {
    %c0_i32 = arith.constant 0 : i32
    %c0_i32_0 = arith.constant 0 : i32
    %c0_i32_1 = arith.constant 0 : i32
    return %arg0, %c0_i32, %c0_i32_0 : i32, i32, i32
  }
  func.func @transform_1(%arg0: i32) -> (i32, i32) {
    %c0_i32 = arith.constant 0 : i32
    %c0_i32_0 = arith.constant 0 : i32
    %c0_i32_1 = arith.constant 0 : i32
    return %c0_i32, %c0_i32_0 : i32, i32
  }
  func.func @transform_2(%arg0: i32) -> (i32, i32) {
    %c0_i32 = arith.constant 0 : i32
    %c0_i32_0 = arith.constant 0 : i32
    %c0_i32_1 = arith.constant 0 : i32
    return %c0_i32, %c0_i32_0 : i32, i32
  }
  func.func @transform_3(%arg0: i32) -> (i32, i32) {
    %c0_i32 = arith.constant 0 : i32
    %c0_i32_0 = arith.constant 0 : i32
    %c0_i32_1 = arith.constant 0 : i32
    return %c0_i32, %c0_i32_0 : i32, i32
  }
  func.func @transform_4(%arg0: i32) -> (i32, i32, i32) {
    %c0_i32 = arith.constant 0 : i32
    %c0_i32_0 = arith.constant 0 : i32
    %c0_i32_1 = arith.constant 0 : i32
    return %arg0, %c0_i32, %c0_i32_0 : i32, i32, i32
  }
  func.func @transform_5(%arg0: i32) -> (i32, i32, i32) {
    %c0_i32 = arith.constant 0 : i32
    %c0_i32_0 = arith.constant 0 : i32
    %c0_i32_1 = arith.constant 0 : i32
    return %arg0, %c0_i32, %c0_i32_0 : i32, i32, i32
  }
}

</mosaic_0001>

<bundles_post_ra>
// kernel: tpu_custom_call.1
= control target key start
LH: loop header
LB: loop body
LE: loop exit
PB: predicated region body
PF: predicated region fallthrough
CT: control target
= control target key end

     0   :  { %11 = vsyncpa [#allocation5], 0  ;;  %s1405_s0 = inlined_call_operand.hbm [shape: bf16[2,8,32], index: 0, kind: input, shape index: {}]   ;;  %s1406_s1 = inlined_call_operand.hbm [shape: bf16[32,96], index: 1, kind: input, shape index: {}]   ;;  %s1407_s2 = inlined_call_operand.hbm [shape: bf16[32,32], index: 2, kind: input, shape index: {}]   ;;  %s1408_s3 = inlined_call_operand.vmem [shape: f32[1,32], index: 3, kind: input, shape index: {}]   ;;  %s1409_s4 = inlined_call_operand.hbm [shape: f32[2,8,32], index: 4, kind: output, shape index: {0}]   ;;  %s1410_s5 = inlined_call_operand.hbm [shape: f32[2,4,8], index: 5, kind: output, shape index: {1}]  }
   0x1   :  { %13 = vsyncpa [#allocation5 + $0x1], 0 }
   0x2   :  { %14 = vsyncpa [#allocation8], 0 }
   0x3   :  { %15 = vsyncpa [#allocation6], 0 }
   0x4   :  { %17 = vsyncpa [#allocation6 + $0x1], 0 }
   0x5   :  { %18 = vsyncpa [#allocation12], 0 }
   0x6   :  { %20 = vsyncpa [#allocation12 + $0x1], 0  ;;  %s1184_s18 = smov 0   ;;  %s1186_s19 = smov 0  }
   0x7   :  { %s1188_s20 = smov 0   ;;  %s1190_s21 = smov 0  }
   0x8 LB: > { %s183_s24 = sshll.u32 %s1406_s1, 4  ;;  %s1208_s25 = sadd.s32 4294967295, %s1134_s21   ;;  %s1134_s21 = sphi %s1190_s21, %s1421_s21   ;;  %s1130_s20 = sphi %s1188_s20, %s1420_s20   ;;  %s1126_s19 = sphi %s1186_s19, %s1419_s19   ;;  %s1122_s18 = sphi %s1184_s18, %s1418_s18   ;;  %s184_s24 = int_to_ptr.hbm [resolvable:$true] %s183_s24 }
   0x9   : > { %p789_p0 = scmp.ge.s32.totalorder %s1134_s21, 1  ;;  %p47_p1 = scmp.eq.s32.totalorder %s1208_s25, 0 }
   0xa   : > { %p172_p2 = scmp.lt.s32.totalorder %s1134_s21, 3  ;;  %s1136_s27 = smov [#allocation7]  }
   0xb   : > { %s185_s28 = sshll.u32 %s1136_s27, 4  ;;  %s197_s6 = sshll.u32 %s1407_s2, 4  ;;  %s186_s28 = int_to_ptr.vmem [resolvable:$true] %s185_s28  ;;  %s198_s6 = int_to_ptr.hbm [resolvable:$true] %s197_s6 }
   0xc   : > { %p1213_p3 = pnand %p789_p0, %p172_p2  ;;  %s1137_s7 = smov [#allocation9]  }
   0xd   : > { %s199_s8 = sshll.u32 %s1137_s7, 4  ;;  %s1138_s9 = smov 64   ;;  %s200_s8 = int_to_ptr.vmem [resolvable:$true] %s199_s8 }
   0xe   : > { %p851_p4 = pneg %p1213_p3  ;;  %s1139_s10 = smov 4  }
   0xf   : > { %s788_s11 = sadd.s32 4294967294, %s1134_s21   ;;  %s1227_s12 = sadd.s32 1, %s1134_s21  }
  0x10   : > { %p852_p6 = pnand %p851_p4, %p47_p1  ;;  %s30_s13 = ssub.s32 %s1134_s21, %s1227_s12 }
  0x11   : > { %s33_s14 = sadd.s32 1, %s1130_s20  ;;  %p31_p7 = scmp.eq.s32.totalorder %s30_s13, 0 }
  0x12   : > { %854 = dma.hbm_to_vmem [thread:$0]  (!%p852_p6), %s184_s24, 256, %s186_s28, [#allocation8], %s1138_s9, %s1138_s9, %s1139_s10  }
  0x13   : > { %857 = dma.hbm_to_vmem [thread:$0]  (!%p852_p6), %s198_s6, 256, %s200_s8, [#allocation8], %s1138_s9, %s1138_s9, %s1139_s10  }
  0x14   : > { %p40_p8 = scmp.ne.s32.totalorder %s1130_s20, %s1126_s19  ;;  %p41_p9 = scmp.eq.s32.totalorder %s1134_s21, 0 }
  0x15   : > { %p46_p10 = scmp.ne.s32.totalorder %s1126_s19, %s1122_s18  ;;  %p133_p13 = scmp.eq.s32.totalorder %s1208_s25, 1 }
  0x16   : > { %s1238_s15 = scalar_select %p31_p7, %s1130_s20, %s33_s14  }
  0x17   : > { %p1240_p11 = por %p41_p9, %p40_p8  ;;  %p1246_p12 = por %p47_p1, %p46_p10 }
  0x18   : > { %p139_p0 = scmp.eq.s32.totalorder %s788_s11, 1  ;;  %p871_p2 = scmp.lt.s32.totalorder %s1134_s21, 2 }
  0x19   : > { %s216_s22 = sand.u32 1, %s1130_s20   ;;  %p1253_p4 = por %p133_p13, %p40_p8 }
  0x1a   : > { %p1257_p6 = por %p139_p0, %p46_p10  ;;  %s793_s27 = sshll.u32 %s216_s22, 2 }
  0x1b   : > { %s794_s28 = sshll.u32 %s1134_s21, 2  ;;  %s220_s7 = scalar_lea.vmem [#allocation4], %s793_s27 }
  0x1c   : > { %s224_s6 = scalar_lea.hbm %s1405_s0, %s794_s28  ;;  %s228_s8 = sshll.u32 %s220_s7, 4  ;;  %s229_s8 = int_to_ptr.vmem [resolvable:$true] %s228_s8 }
  0x1d   : > { %s226_s9 = sshll.u32 %s224_s6, 4  ;;  %p1267_p7 = pnand %p871_p2, %p1240_p11  ;;  %s227_s9 = int_to_ptr.hbm [resolvable:$true] %s226_s9 }
  0x1e   : > { %s217_s11 = scalar_lea.sflag [#allocation5], %s216_s22  ;;  %s1002_s13 = sshra.s32 %s227_s9, 4  ;;  %s1003_s13 = int_to_ptr.hbm [resolvable:$true] %s1002_s13 }
  0x1f   : > { %s1004_s14 = scalar_lea.hbm %s1003_s13, 4  ;;  %p1006_p9 = pneg %p1267_p7 }
  0x20   : > { %p1005_p8 = scmp.ne.s32.totalorder %s1003_s13, %s1004_s14  ;;  %s1009_s29 = scalar_lea.hbm %s1405_s0, 8 }
  0x21   : > { %p1010_p11 = scmp.lt.s32.totalorder %s1003_s13, %s1405_s0  ;;  %p1011_p0 = scmp.lt.s32.totalorder %s1009_s29, %s1004_s14 }
  0x22   : > { %p1007_p10 = pnand %p1006_p9, %p1005_p8 }
  0x23   : > { %p1012_p2 = por %p1011_p0, %p1010_p11 }
  0x24   : > { %p1008_p13 = pneg %p1007_p10 }
  0x26   : > { %p1013_p5 = pnand %p1012_p2, %p1008_p13 }
  0x28   : > { %1016 = shalt.err (!%p1013_p5)
}
  0x29   : > { %861 = dma.hbm_to_vmem [thread:$0]  (!%p1267_p7), %s227_s9, 64, %s229_s8, %s217_s11  }
  0x2a   : > { %237 = sbr.rel (%p1213_p3) target bundleno = 1142 (0x476), region = 36  ;;  %s1284_s22 = sand.u32 (!%p1213_p3), 1, %s1126_s19  }
  0x2b   : > { %s796_s6 = sshll.u32 (!%p1213_p3), %s1284_s22, 2  ;;  %s240_s7 = scalar_lea.sflag (!%p1213_p3), [#allocation5], %s1284_s22 }
  0x2c   : > { %s243_s13 = scalar_lea.vmem (!%p1213_p3), [#allocation4], %s796_s6 }
  0x2f   : > { %1105 = dma.done.wait (%p1246_p12), %s240_s7, 64  }
  0x30   : > { %1107 = vsyncadd (%p1246_p12), %s240_s7, 4294967232 }
  0x31   : > { %1109 = dma.done.wait (%p47_p1), [#allocation8], 512  }
  0x32   : > { %1111 = vsyncadd (%p47_p1), [#allocation8], 4294966784  ;;  %v834_v0 = vld [vmem:[#allocation7 + $0x8] sm:$0xff]  ;;  %v833_v1 = vld [vmem:[#allocation7] sm:$0xff]  ;;  %vm304_vm0 = vcmask 261120   ;;  %vm322_vm1 = vcmask 781312  }
  0x33   : > { %314 = vmatpush.bf16.msra.mxu0 %v834_v0  ;;  %v287_v2 = vld [vmem:[%s243_s13] sm:$0xf]  ;;  %s1140_s26 = smov 104   ;;  %s1141_s17 = smov 120   ;;  %vm330_vm2 = vcmask 64512   ;;  %vm350_vm3 = vcmask 57344  }
  0x34   : > { %s1142_s8 = smov 96   ;;  %s1143_s9 = smov 80   ;;  %vm369_vm4 = vcmask 1043456   ;;  %vm387_vm5 = vcmask 60416   ;;  %vm455_vm6 = vcmask 126016   ;;  %vm523_vm7 = vcmask 191616  }
  0x35   : > { %s1144_s10 = smov 72   ;;  %s1145_s11 = smov 88   ;;  %vm591_vm8 = vcmask 257216  }
  0x36   : > { %s1146_s14 = smov 112   ;;  %s1321_s27 = scalar_lea.vmem [#allocation11], %s796_s6 }
  0x37   : > { %315 = vmatpush.bf16.msra.mxu0 %v833_v1  ;;  %s1147_s28 = smov 64   ;;  %s1148_s29 = smov 40  }
  0x38   : > { %s1149_s30 = smov 56   ;;  %s1150_s16 = smov 48  }
  0x39   : > { %s1151_s6 = smov 8   ;;  %s1152_s7 = smov 16  }
  0x3a   : > { %809 = vmatmul.msk.bf16.vlgmr.msra.gmra.mxu0 %vm304_vm0, %v287_v2  ;;  %s1153_s13 = smov 24  }
  0xb7   : > { %v317_v3 = vpop.f32.mrf.mxu0 }
  0xb8   : > { %v321_v4 = vpack.c.bf16 %v317_v3, %v317_v3 }
  0xba   : > { %323 = vst.msk [vmem:[#allocation2] sm:$0xf] %vm322_vm1, %v321_v4 }
  0xbf   : > { %v319_v5 = vpop.f32.mrf.mxu0 }
  0xc1   : > { %v525_v6 = vld [vmem:[#allocation2] sm:$0xf] }
  0xc2   : > { %v389_v7 = vld [vmem:[#allocation2] sm:$0xf]  ;;  %v527_v9 = vunpack.c.l.b16 %v525_v6 }
  0xc3   : > { %v324_v8 = vld [vmem:[#allocation2] sm:$0xf]  ;;  %v391_v10 = vunpack.c.l.b16 %v389_v7 }
  0xc4   : > { %v326_v11 = vunpack.c.l.b16 %v324_v8  ;;  %v1299_v12 = vpack.c.b16 %v527_v9, %v527_v9  ;;  %v457_v15 = vld [vmem:[#allocation2] sm:$0xf] }
  0xc5   : > { %v1301_v13 = vpack.c.b16 %v391_v10, %v391_v10  ;;  %v459_v16 = vunpack.c.l.b16 %v457_v15 }
  0xc6   : > { %v327_v14 = vpack.c.b16 %v326_v11, %v326_v11  ;;  %529 = vrot.lane.b32.xlu2 %v1299_v12, %s1140_s26  ;;  %s830_s26 = sshll.u32 %s1208_s25, 2 }
  0xc7   : > { %393 = vrot.lane.b32.xlu1 %v1301_v13, %s1141_s17  ;;  %v1305_v17 = vpack.c.b16 %v459_v16, %v459_v16 }
  0xc8   : > { %328 = vrot.lane.b32.xlu0 %v327_v14, %s1142_s8 }
  0xce   : > { %463 = vrot.lane.b32.xlu2 %v1305_v17, %s1143_s9  ;;  %s661_s9 = scalar_lea.hbm %s1410_s5, %s830_s26 }
  0xcf   : > { %531 = vrot.lane.b32.xlu1 %v1299_v12, %s1144_s10  ;;  %s663_s10 = sshll.u32 %s1321_s27, 4  ;;  %s664_s10 = int_to_ptr.vmem [resolvable:$true] %s663_s10 }
  0xd0   : > { %395 = vrot.lane.b32.xlu0 %v1301_v13, %s1145_s11  ;;  %s665_s11 = sshll.u32 %s661_s9, 4  ;;  %s666_s11 = int_to_ptr.hbm [resolvable:$true] %s665_s11 }
  0xd8   : > { %461 = vrot.lane.b32.xlu0 %v1305_v17, %s1146_s14  ;;  %s637_s14 = scalar_lea.sflag [#allocation12], %s1284_s22 }
 0x120   : > { %v530_v18 = vpop.permute.xlu2 %529 }
 0x128   : > { %v464_v19 = vpop.permute.xlu2 %463 }
 0x129   : > { %v469_v20 = vsel %vm330_vm2, %v464_v19, 0 }
 0x12a   : > { %478 = vmatpush.bf16.xpose.msrb.mxu0 %v469_v20 }
 0x139   : > { %v394_v21 = vpop.permute.xlu1 %393 }
 0x13a   : > { %v329_v22 = vpop.permute.xlu0 %328 }
 0x13b   : > { %v335_v23 = vsel %vm330_vm2, %v329_v22, 0 }
 0x13c   : > { %344 = vmatpush.bf16.xpose.msra.mxu1 %v335_v23 }
 0x141   : > { %v532_v24 = vpop.permute.xlu1 %531 }
 0x142   : > { %v396_v25 = vpop.permute.xlu0 %395  ;;  %v537_v26 = vsel %vm330_vm2, %v532_v24, 0 }
 0x143   : > { %810 = vmatmul.msk.bf16.vlgmr.msra.gmra.mxu1 %vm330_vm2, %v324_v8  ;;  %v401_v27 = vsel %vm330_vm2, %v396_v25, 0 }
 0x144   : > { %410 = vmatpush.bf16.xpose.msra.mxu3 %v401_v27 }
 0x14a   : > { %v462_v28 = vpop.permute.xlu0 %461 }
 0x14b   : > { %812 = vmatmul.msk.bf16.vlgmr.msra.gmra.mxu3 %vm330_vm2, %v394_v21  ;;  %814 = vmatmul.msk.bf16.vlgmr.msrb.gmra.mxu0 %vm330_vm2, %v462_v28 }
 0x14c   : > { %546 = vmatpush.bf16.xpose.msrb.mxu3 %v537_v26 }
 0x15b   : > { %816 = vmatmul.msk.bf16.vlgmr.msrb.gmra.mxu3 %vm330_vm2, %v530_v18 }
 0x1c0   : > { %v346_v29 = vpop.f32.mrf.mxu1 }
 0x1c1   : > { %351 = vst.msk [vmem:[%s1321_s27] sm:$0x1] %vm350_vm3, %v346_v29  ;;  %v352_v30 = vsel %vm330_vm2, %v346_v29, -inf }
 0x1c2   : > { %353 = vmax.xlane.f32.xlu1 %v352_v30 }
 0x1c8   : > { %v348_v31 = vpop.f32.mrf.mxu1  ;;  %v480_v32 = vpop.f32.mrf.mxu0 }
 0x1c9   : > { %484 = vst.msk [vmem:[%s1321_s27 + $0x2] sm:$0x1] %vm350_vm3, %v480_v32  ;;  %v485_v37 = vsel %vm330_vm2, %v480_v32, -inf }
 0x1ce   : > { %v412_v33 = vpop.f32.mrf.mxu3 }
 0x1cf   : > { %416 = vst.msk [vmem:[%s1321_s27 + $0x1] sm:$0x1] %vm350_vm3, %v412_v33  ;;  %v417_v34 = vsel %vm330_vm2, %v412_v33, -inf }
 0x1d0   : > { %418 = vmax.xlane.f32.xlu2 %v417_v34  ;;  %v482_v35 = vpop.f32.mrf.mxu0  ;;  %v835_v34 = vld [vmem:[#allocation9] sm:$0xff] }
 0x1d6   : > { %v414_v36 = vpop.f32.mrf.mxu3 }
 0x1d8   : > { %486 = vmax.xlane.f32.xlu2 %v485_v37 }
 0x1de   : > { %v548_v38 = vpop.f32.mrf.mxu3 }
 0x1df   : > { %552 = vst.msk [vmem:[%s1321_s27 + $0x3] sm:$0x1] %vm350_vm3, %v548_v38  ;;  %v553_v39 = vsel %vm330_vm2, %v548_v38, -inf }
 0x1e0   : > { %554 = vmax.xlane.f32.xlu0 %v553_v39 }
 0x1e6   : > { %v550_v40 = vpop.f32.mrf.mxu3 }
 0x1f0   : > { %364 = vrot.lane.b32.xlu2 %v327_v14, %s1147_s28  ;;  %s1046_s28 = sshra.s32 %s666_s11, 4  ;;  %s1047_s28 = int_to_ptr.hbm [resolvable:$true] %s1046_s28 }
 0x1f1   : > { %p1053_p12 = scmp.lt.s32.totalorder %s1047_s28, %s1410_s5 }
 0x1f8   : > { %565 = vrot.lane.b32.xlu2 %v1299_v12, %s1148_s29  ;;  %s1048_s29 = scalar_lea.hbm %s1047_s28, 4 }
 0x1f9   : > { %p1049_p1 = scmp.ne.s32.totalorder %s1047_s28, %s1048_s29 }
 0x1fb   : > { %p1050_p3 = pnand %p1049_p1, %p1253_p4 }
 0x1fd   : > { %p1051_p5 = pneg %p1050_p3 }
 0x235   : > { %v354_v41 = vpop.xlane.xlu1 %353 }
 0x236   : > { %v355_v42 = vsub.f32 %v346_v29, %v354_v41 }
 0x238   : > { %v356_v43 = vmul.f32 1.442695, %v355_v42 }
 0x23a   : > { %926 = vpow2.f32 %v356_v43 }
 0x240   : > { %v927_v44 = vpop.eup %926 }
 0x241   : > { %v358_v45 = vsel %vm330_vm2, %v927_v44, 0.0 }
 0x242   : > { %359 = vadd.xlane.f32.xlu1 %v358_v45 }
 0x243   : > { %v419_v46 = vpop.xlane.xlu2 %418 }
 0x244   : > { %v420_v49 = vsub.f32 %v412_v33, %v419_v46  ;;  %v836_v33 = vld [vmem:[#allocation9 + $0x8] sm:$0xff] }
 0x245   : > { %623 = vmatpush.bf16.msra.mxu0 %v836_v33 }
 0x246   : > { %v421_v51 = vmul.f32 1.442695, %v420_v49 }
 0x249   : > { %624 = vmatpush.bf16.msra.mxu0 %v835_v34 }
 0x24b   : > { %v487_v47 = vpop.xlane.xlu2 %486 }
 0x24c   : > { %v488_v48 = vsub.f32 %v480_v32, %v487_v47 }
 0x24e   : > { %v489_v50 = vmul.f32 1.442695, %v488_v48 }
 0x250   : > { %928 = vpow2.f32 %v489_v50 }
 0x251   : > { %930 = vpow2.f32 %v421_v51 }
 0x253   : > { %v555_v52 = vpop.xlane.xlu0 %554  ;;  %v365_v53 = vpop.permute.xlu2 %364 }
 0x254   : > { %v371_v54 = vsel %vm369_vm4, %v365_v53, 0  ;;  %v556_v56 = vsub.f32 %v548_v38, %v555_v52 }
 0x255   : > { %380 = vmatpush.bf16.msra.mxu2 %v371_v54 }
 0x256   : > { %v929_v55 = vpop.eup %928  ;;  %v557_v58 = vmul.f32 1.442695, %v556_v56 }
 0x257   : > { %v491_v57 = vsel %vm330_vm2, %v929_v55, 0.0  ;;  %v931_v59 = vpop.eup %930 }
 0x258   : > { %492 = vadd.xlane.f32.xlu0 %v491_v57  ;;  %932 = vpow2.f32 %v557_v58  ;;  %v423_v60 = vsel %vm330_vm2, %v931_v59, 0.0 }
 0x25b   : > { %429 = vrot.lane.b32.xlu1 %v1301_v13, %s1149_s30  ;;  %v566_v4 = vpop.permute.xlu2 %565 }
 0x25c   : > { %v571_v7 = vsel %vm369_vm4, %v566_v4, 0 }
 0x25e   : > { %v933_v61 = vpop.eup %932 }
 0x25f   : > { %v559_v62 = vsel %vm330_vm2, %v933_v61, 0.0 }
 0x260   : > { %424 = vadd.xlane.f32.xlu0 %v423_v60 }
 0x268   : > { %560 = vadd.xlane.f32.xlu0 %v559_v62 }
 0x27c   : > { %497 = vrot.lane.b32.xlu0 %v1305_v17, %s1150_s16 }
 0x2b5   : > { %v360_v63 = vpop.xlane.xlu1 %359 }
 0x2b6   : > { %934 = vrcp.f32 %v360_v63 }
 0x2bc   : > { %v935_v0 = vpop.eup %934 }
 0x2bd   : > { %v362_v1 = vmul.f32 %v935_v0, %v927_v44 }
 0x2bf   : > { %v363_v2 = vpack.c.bf16 %v362_v1, %v362_v1 }
 0x2c1   : > { %811 = vmatmul.msk.bf16.vlgmr.msra.gmra.mxu2 %vm330_vm2, %v363_v2 }
 0x2cb   : > { %v493_v3 = vpop.xlane.xlu0 %492 }
 0x2cd   : > { %v430_v5 = vpop.permute.xlu1 %429 }
 0x2ce   : > { %v435_v6 = vsel %vm369_vm4, %v430_v5, 0 }
 0x2cf   : > { %444 = vmatpush.bf16.msrb.mxu2 %v435_v6 }
 0x2d3   : > { %580 = vmatpush.bf16.msra.mxu2 %v571_v7  ;;  %v425_v8 = vpop.xlane.xlu0 %424 }
 0x2d4   : > { %936 = vrcp.f32 %v425_v8 }
 0x2da   : > { %v937_v9 = vpop.eup %936 }
 0x2db   : > { %v427_v10 = vmul.f32 %v937_v9, %v931_v59  ;;  %v561_v11 = vpop.xlane.xlu0 %560 }
 0x2dc   : > { %938 = vrcp.f32 %v561_v11 }
 0x2dd   : > { %v428_v12 = vpack.c.bf16 %v427_v10, %v427_v10  ;;  %940 = vrcp.f32 %v493_v3 }
 0x2df   : > { %813 = vmatmul.msk.bf16.vlgmr.msrb.gmra.mxu2 %vm330_vm2, %v428_v12 }
 0x2e2   : > { %v939_v13 = vpop.eup %938 }
 0x2e3   : > { %v563_v14 = vmul.f32 %v939_v13, %v933_v61  ;;  %v941_v15 = vpop.eup %940 }
 0x2e4   : > { %v495_v16 = vmul.f32 %v941_v15, %v929_v55 }
 0x2e5   : > { %v564_v17 = vpack.c.bf16 %v563_v14, %v563_v14 }
 0x2e6   : > { %v496_v20 = vpack.c.bf16 %v495_v16, %v495_v16 }
 0x2ee   : > { %v498_v18 = vpop.permute.xlu0 %497 }
 0x2ef   : > { %817 = vmatmul.msk.bf16.vlgmr.msra.gmra.mxu2 %vm330_vm2, %v564_v17  ;;  %v503_v19 = vsel %vm369_vm4, %v498_v18, 0 }
 0x2f0   : > { %512 = vmatpush.bf16.msrb.mxu1 %v503_v19 }
 0x2f3   : > { %815 = vmatmul.msk.bf16.vlgmr.msrb.gmra.mxu1 %vm330_vm2, %v496_v20 }
 0x344   : > { %v382_v21 = vpop.f32.mrf.mxu2 }
 0x345   : > { %v386_v22 = vpack.c.bf16 %v382_v21, %v382_v21 }
 0x347   : > { %388 = vst.msk [vmem:[#allocation3] sm:$0xf] %vm387_vm5, %v386_v22 }
 0x34c   : > { %v384_v23 = vpop.f32.mrf.mxu2 }
 0x362   : > { %v446_v24 = vpop.f32.mrf.mxu2 }
 0x363   : > { %v450_v25 = vpack.c.bf16 %v446_v24, %v446_v24 }
 0x365   : > { %452 = vrot.lane.b32.xlu1 %v450_v25, %s1151_s6  ;;  %s1052_s6 = scalar_lea.hbm %s1410_s5, 8 }
 0x366   : > { %p1054_p7 = scmp.lt.s32.totalorder %s1052_s6, %s1048_s29 }
 0x368   : > { %p1055_p8 = por %p1054_p7, %p1053_p12 }
 0x36a   : > { %v448_v26 = vpop.f32.mrf.mxu2  ;;  %p1056_p9 = pnand %p1055_p8, %p1051_p5 }
 0x370   : > { %v514_v27 = vpop.f32.mrf.mxu1 }
 0x371   : > { %v518_v28 = vpack.c.bf16 %v514_v27, %v514_v27 }
 0x372   : > { %v582_v29 = vpop.f32.mrf.mxu2 }
 0x373   : > { %v586_v30 = vpack.c.bf16 %v582_v29, %v582_v29  ;;  %520 = vrot.lane.b32.xlu2 %v518_v28, %s1152_s7 }
 0x375   : > { %588 = vrot.lane.b32.xlu1 %v586_v30, %s1153_s13 }
 0x378   : > { %v516_v31 = vpop.f32.mrf.mxu1 }
 0x37a   : > { %v584_v32 = vpop.f32.mrf.mxu2 }
 0x3cd   : > { %v521_v36 = vpop.permute.xlu2 %520 }
 0x3d7   : > { %v453_v35 = vpop.permute.xlu1 %452 }
 0x3d8   : > { %456 = vst.msk [vmem:[#allocation3] sm:$0xf] %vm455_vm6, %v453_v35 }
 0x3d9   : > { %524 = vst.msk [vmem:[#allocation3] sm:$0xf] %vm523_vm7, %v521_v36 }
 0x3e7   : > { %v589_v37 = vpop.permute.xlu1 %588 }
 0x3e8   : > { %592 = vst.msk [vmem:[#allocation3] sm:$0xf] %vm591_vm8, %v589_v37 }
 0x3ef   : > { %v593_v38 = vld [vmem:[#allocation3] sm:$0xf] }
 0x3f0   : > { %826 = vmatmul.msk.bf16.vlgmr.msra.gmra.mxu0 %vm304_vm0, %v593_v38 }
 0x3f1   : > { %1059 = shalt.err (!%p1056_p9)
}
 0x3f2   : > { %848 = dma.vmem_to_hbm [thread:$0]  (%p1253_p4), %s664_s10, 64, %s666_s11, %s637_s14   ;;  %v925_v39 = vld [vmem:[%s1408_s3] ss:$0 sm:$0xff] }
 0x3f3   : > { %s829_s27 = sshll.u32 %s1208_s25, 3  ;;  %s799_s26 = sshll.u32 %s1284_s22, 3 }
 0x3f4   : > { %s647_s9 = scalar_lea.hbm %s1409_s4, %s829_s27  ;;  %s278_s28 = scalar_lea.vmem [#allocation10], %s799_s26 }
 0x3f5   : > { %s649_s29 = sshll.u32 %s278_s28, 4  ;;  %s651_s6 = sshll.u32 %s647_s9, 4  ;;  %s650_s29 = int_to_ptr.vmem [resolvable:$true] %s649_s29  ;;  %s652_s6 = int_to_ptr.hbm [resolvable:$true] %s651_s6 }
 0x3f6   : > { %s632_s25 = scalar_lea.sflag [#allocation6], %s1284_s22  ;;  %s1074_s10 = sshra.s32 %s652_s6, 4  ;;  %s1075_s10 = int_to_ptr.hbm [resolvable:$true] %s1074_s10 }
 0x3f7   : > { %s1076_s11 = scalar_lea.hbm %s1075_s10, 8  ;;  %s1080_s13 = scalar_lea.hbm %s1409_s4, 16 }
 0x3f8   : > { %p1077_p10 = scmp.ne.s32.totalorder %s1075_s10, %s1076_s11  ;;  %p1081_p0 = scmp.lt.s32.totalorder %s1075_s10, %s1409_s4 }
 0x3f9   : > { %p1082_p2 = scmp.lt.s32.totalorder %s1080_s13, %s1076_s11 }
 0x3fa   : > { %p1078_p13 = pnand %p1077_p10, %p1253_p4 }
 0x3fb   : > { %p1083_p1 = por %p1082_p2, %p1081_p0 }
 0x3fc   : > { %p1079_p11 = pneg %p1078_p13 }
 0x3fe   : > { %p1084_p3 = pnand %p1083_p1, %p1079_p11 }
 0x46d   : > { %v626_v40 = vpop.f32.mrf.mxu0 }
 0x46e   : > { %v627_v41 = vadd.f32 %v925_v39, %v626_v40 }
 0x470   : > { %630 = vst.msk [vmem:[%s278_s28] sm:$0xff] %vm304_vm0, %v627_v41 }
 0x471   : > { %1087 = shalt.err (!%p1084_p3)
}
 0x472   : > { %847 = dma.vmem_to_hbm [thread:$0]  (%p1253_p4), %s650_s29, 128, %s652_s6, %s632_s25  }
 0x475   : > { %v628_v42 = vpop.f32.mrf.mxu0 }
 0x476 PF: > { %s677_s22 = sand.u32 1, %s1122_s18   ;;  %p1417_p5 = scmp.ge.s32.totalorder %s1134_s21, 2 }
 0x477   : > { %s678_s17 = scalar_lea.sflag [#allocation6], %s677_s22 }
 0x478   : > { %p863_p12 = pnand %p1417_p5, %p1257_p6 }
 0x47a   : > { %p864_p7 = pneg %p863_p12 }
 0x47c   : > { %1113 = dma.done.wait (%p864_p7), %s678_s17, 128  }
 0x47d   : > { %1115 = vsyncadd (%p864_p7), %s678_s17, 4294967168  ;;  %s688_s8 = scalar_lea.sflag [#allocation12], %s677_s22 }
 0x47e   : > { %1117 = dma.done.wait (%p864_p7), %s688_s8, 64  }
 0x47f   : > { %1119 = vsyncadd (%p864_p7), %s688_s8, 4294967232  ;;  %p23_p4 = scmp.ge.s32.totalorder %s1227_s12, 4   ;;  %s1418_s18 = smov %s1126_s19 }
 0x480   : > { %s1419_s19 = smov %s1130_s20  ;;  %s1420_s20 = smov %s1238_s15 }
 0x481   : > { %s1421_s21 = smov %s1227_s12  ;;  %25 = sbr.rel (!%p23_p4) target bundleno = 8 (0x8), region = 106 }
 0x486   :  { %694 = vsyncpa [#allocation5], 1 }
 0x487   :  { %696 = vsyncpa [#allocation5 + $0x1], 1 }
 0x488   :  { %697 = vsyncpa [#allocation8], 1 }
 0x489   :  { %698 = vsyncpa [#allocation6], 1 }
 0x48a   :  { %700 = vsyncpa [#allocation6 + $0x1], 1 }
 0x48b   :  { %701 = vsyncpa [#allocation12], 1 }
 0x48c   :  { %703 = vsyncpa [#allocation12 + $0x1], 1 }

// kernel: tpu_custom_call.1
= control target key start
LH: loop header
LB: loop body
LE: loop exit
PB: predicated region body
PF: predicated region fallthrough
CT: control target
= control target key end

     0   :  { %11 = vsyncpa [#allocation5], 0  ;;  %s1405_s0 = inlined_call_operand.hbm [shape: bf16[2,8,32], index: 0, kind: input, shape index: {}]   ;;  %s1406_s1 = inlined_call_operand.hbm [shape: bf16[32,96], index: 1, kind: input, shape index: {}]   ;;  %s1407_s2 = inlined_call_operand.hbm [shape: bf16[32,32], index: 2, kind: input, shape index: {}]   ;;  %s1408_s3 = inlined_call_operand.vmem [shape: f32[1,32], index: 3, kind: input, shape index: {}]   ;;  %s1409_s4 = inlined_call_operand.hbm [shape: f32[2,8,32], index: 4, kind: output, shape index: {0}]   ;;  %s1410_s5 = inlined_call_operand.hbm [shape: f32[2,4,8], index: 5, kind: output, shape index: {1}]  }
   0x1   :  { %13 = vsyncpa [#allocation5 + $0x1], 0 }
   0x2   :  { %14 = vsyncpa [#allocation8], 0 }
   0x3   :  { %15 = vsyncpa [#allocation6], 0 }
   0x4   :  { %17 = vsyncpa [#allocation6 + $0x1], 0 }
   0x5   :  { %18 = vsyncpa [#allocation12], 0 }
   0x6   :  { %20 = vsyncpa [#allocation12 + $0x1], 0  ;;  %s1184_s18 = smov 0   ;;  %s1186_s19 = smov 0  }
   0x7   :  { %s1188_s20 = smov 0   ;;  %s1190_s21 = smov 0  }
   0x8 LB: > { %s183_s24 = sshll.u32 %s1406_s1, 4  ;;  %s1208_s25 = sadd.s32 4294967295, %s1134_s21   ;;  %s1134_s21 = sphi %s1190_s21, %s1421_s21   ;;  %s1130_s20 = sphi %s1188_s20, %s1420_s20   ;;  %s1126_s19 = sphi %s1186_s19, %s1419_s19   ;;  %s1122_s18 = sphi %s1184_s18, %s1418_s18   ;;  %s184_s24 = int_to_ptr.hbm [resolvable:$true] %s183_s24 }
   0x9   : > { %p789_p0 = scmp.ge.s32.totalorder %s1134_s21, 1  ;;  %p47_p1 = scmp.eq.s32.totalorder %s1208_s25, 0 }
   0xa   : > { %p172_p2 = scmp.lt.s32.totalorder %s1134_s21, 3  ;;  %s1136_s27 = smov [#allocation7]  }
   0xb   : > { %s185_s28 = sshll.u32 %s1136_s27, 4  ;;  %s197_s6 = sshll.u32 %s1407_s2, 4  ;;  %s186_s28 = int_to_ptr.vmem [resolvable:$true] %s185_s28  ;;  %s198_s6 = int_to_ptr.hbm [resolvable:$true] %s197_s6 }
   0xc   : > { %p1213_p3 = pnand %p789_p0, %p172_p2  ;;  %s1137_s7 = smov [#allocation9]  }
   0xd   : > { %s199_s8 = sshll.u32 %s1137_s7, 4  ;;  %s1138_s9 = smov 64   ;;  %s200_s8 = int_to_ptr.vmem [resolvable:$true] %s199_s8 }
   0xe   : > { %p851_p4 = pneg %p1213_p3  ;;  %s1139_s10 = smov 4  }
   0xf   : > { %s788_s11 = sadd.s32 4294967294, %s1134_s21   ;;  %s1227_s12 = sadd.s32 1, %s1134_s21  }
  0x10   : > { %p852_p6 = pnand %p851_p4, %p47_p1  ;;  %s30_s13 = ssub.s32 %s1134_s21, %s1227_s12 }
  0x11   : > { %s33_s14 = sadd.s32 1, %s1130_s20  ;;  %p31_p7 = scmp.eq.s32.totalorder %s30_s13, 0 }
  0x12   : > { %854 = dma.hbm_to_vmem [thread:$0]  (!%p852_p6), %s184_s24, 256, %s186_s28, [#allocation8], %s1138_s9, %s1138_s9, %s1139_s10  }
  0x13   : > { %857 = dma.hbm_to_vmem [thread:$0]  (!%p852_p6), %s198_s6, 256, %s200_s8, [#allocation8], %s1138_s9, %s1138_s9, %s1139_s10  }
  0x14   : > { %p40_p8 = scmp.ne.s32.totalorder %s1130_s20, %s1126_s19  ;;  %p41_p9 = scmp.eq.s32.totalorder %s1134_s21, 0 }
  0x15   : > { %p46_p10 = scmp.ne.s32.totalorder %s1126_s19, %s1122_s18  ;;  %p133_p13 = scmp.eq.s32.totalorder %s1208_s25, 1 }
  0x16   : > { %s1238_s15 = scalar_select %p31_p7, %s1130_s20, %s33_s14  }
  0x17   : > { %p1240_p11 = por %p41_p9, %p40_p8  ;;  %p1246_p12 = por %p47_p1, %p46_p10 }
  0x18   : > { %p139_p0 = scmp.eq.s32.totalorder %s788_s11, 1  ;;  %p871_p2 = scmp.lt.s32.totalorder %s1134_s21, 2 }
  0x19   : > { %s216_s22 = sand.u32 1, %s1130_s20   ;;  %p1253_p4 = por %p133_p13, %p40_p8 }
  0x1a   : > { %p1257_p6 = por %p139_p0, %p46_p10  ;;  %s793_s27 = sshll.u32 %s216_s22, 2 }
  0x1b   : > { %s794_s28 = sshll.u32 %s1134_s21, 2  ;;  %s220_s7 = scalar_lea.vmem [#allocation4], %s793_s27 }
  0x1c   : > { %s224_s6 = scalar_lea.hbm %s1405_s0, %s794_s28  ;;  %s228_s8 = sshll.u32 %s220_s7, 4  ;;  %s229_s8 = int_to_ptr.vmem [resolvable:$true] %s228_s8 }
  0x1d   : > { %s226_s9 = sshll.u32 %s224_s6, 4  ;;  %p1267_p7 = pnand %p871_p2, %p1240_p11  ;;  %s227_s9 = int_to_ptr.hbm [resolvable:$true] %s226_s9 }
  0x1e   : > { %s217_s11 = scalar_lea.sflag [#allocation5], %s216_s22  ;;  %s1002_s13 = sshra.s32 %s227_s9, 4  ;;  %s1003_s13 = int_to_ptr.hbm [resolvable:$true] %s1002_s13 }
  0x1f   : > { %s1004_s14 = scalar_lea.hbm %s1003_s13, 4  ;;  %p1006_p9 = pneg %p1267_p7 }
  0x20   : > { %p1005_p8 = scmp.ne.s32.totalorder %s1003_s13, %s1004_s14  ;;  %s1009_s29 = scalar_lea.hbm %s1405_s0, 8 }
  0x21   : > { %p1010_p11 = scmp.lt.s32.totalorder %s1003_s13, %s1405_s0  ;;  %p1011_p0 = scmp.lt.s32.totalorder %s1009_s29, %s1004_s14 }
  0x22   : > { %p1007_p10 = pnand %p1006_p9, %p1005_p8 }
  0x23   : > { %p1012_p2 = por %p1011_p0, %p1010_p11 }
  0x24   : > { %p1008_p13 = pneg %p1007_p10 }
  0x26   : > { %p1013_p5 = pnand %p1012_p2, %p1008_p13 }
  0x28   : > { %1016 = shalt.err (!%p1013_p5)
}
  0x29   : > { %861 = dma.hbm_to_vmem [thread:$0]  (!%p1267_p7), %s227_s9, 64, %s229_s8, %s217_s11  }
  0x2a   : > { %237 = sbr.rel (%p1213_p3) target bundleno = 1142 (0x476), region = 36  ;;  %s1284_s22 = sand.u32 (!%p1213_p3), 1, %s1126_s19  }
  0x2b   : > { %s796_s6 = sshll.u32 (!%p1213_p3), %s1284_s22, 2  ;;  %s240_s7 = scalar_lea.sflag (!%p1213_p3), [#allocation5], %s1284_s22 }
  0x2c   : > { %s243_s13 = scalar_lea.vmem (!%p1213_p3), [#allocation4], %s796_s6 }
  0x2f   : > { %1105 = dma.done.wait (%p1246_p12), %s240_s7, 64  }
  0x30   : > { %1107 = vsyncadd (%p1246_p12), %s240_s7, 4294967232 }
  0x31   : > { %1109 = dma.done.wait (%p47_p1), [#allocation8], 512  }
  0x32   : > { %1111 = vsyncadd (%p47_p1), [#allocation8], 4294966784  ;;  %v834_v0 = vld [vmem:[#allocation7 + $0x8] sm:$0xff]  ;;  %v833_v1 = vld [vmem:[#allocation7] sm:$0xff]  ;;  %vm304_vm0 = vcmask 261120   ;;  %vm322_vm1 = vcmask 781312  }
  0x33   : > { %314 = vmatpush.bf16.msra.mxu0 %v834_v0  ;;  %v287_v2 = vld [vmem:[%s243_s13] sm:$0xf]  ;;  %s1140_s26 = smov 104   ;;  %s1141_s17 = smov 120   ;;  %vm330_vm2 = vcmask 64512   ;;  %vm350_vm3 = vcmask 57344  }
  0x34   : > { %s1142_s8 = smov 96   ;;  %s1143_s9 = smov 80   ;;  %vm369_vm4 = vcmask 1043456   ;;  %vm387_vm5 = vcmask 60416   ;;  %vm455_vm6 = vcmask 126016   ;;  %vm523_vm7 = vcmask 191616  }
  0x35   : > { %s1144_s10 = smov 72   ;;  %s1145_s11 = smov 88   ;;  %vm591_vm8 = vcmask 257216  }
  0x36   : > { %s1146_s14 = smov 112   ;;  %s1321_s27 = scalar_lea.vmem [#allocation11], %s796_s6 }
  0x37   : > { %315 = vmatpush.bf16.msra.mxu0 %v833_v1  ;;  %s1147_s28 = smov 64   ;;  %s1148_s29 = smov 40  }
  0x38   : > { %s1149_s30 = smov 56   ;;  %s1150_s16 = smov 48  }
  0x39   : > { %s1151_s6 = smov 8   ;;  %s1152_s7 = smov 16  }
  0x3a   : > { %809 = vmatmul.msk.bf16.vlgmr.msra.gmra.mxu0 %vm304_vm0, %v287_v2  ;;  %s1153_s13 = smov 24  }
  0xb7   : > { %v317_v3 = vpop.f32.mrf.mxu0 }
  0xb8   : > { %v321_v4 = vpack.c.bf16 %v317_v3, %v317_v3 }
  0xba   : > { %323 = vst.msk [vmem:[#allocation2] sm:$0xf] %vm322_vm1, %v321_v4 }
  0xbf   : > { %v319_v5 = vpop.f32.mrf.mxu0 }
  0xc1   : > { %v525_v6 = vld [vmem:[#allocation2] sm:$0xf] }
  0xc2   : > { %v389_v7 = vld [vmem:[#allocation2] sm:$0xf]  ;;  %v527_v9 = vunpack.c.l.b16 %v525_v6 }
  0xc3   : > { %v324_v8 = vld [vmem:[#allocation2] sm:$0xf]  ;;  %v391_v10 = vunpack.c.l.b16 %v389_v7 }
  0xc4   : > { %v326_v11 = vunpack.c.l.b16 %v324_v8  ;;  %v1299_v12 = vpack.c.b16 %v527_v9, %v527_v9  ;;  %v457_v15 = vld [vmem:[#allocation2] sm:$0xf] }
  0xc5   : > { %v1301_v13 = vpack.c.b16 %v391_v10, %v391_v10  ;;  %v459_v16 = vunpack.c.l.b16 %v457_v15 }
  0xc6   : > { %v327_v14 = vpack.c.b16 %v326_v11, %v326_v11  ;;  %529 = vrot.lane.b32.xlu2 %v1299_v12, %s1140_s26  ;;  %s830_s26 = sshll.u32 %s1208_s25, 2 }
  0xc7   : > { %393 = vrot.lane.b32.xlu1 %v1301_v13, %s1141_s17  ;;  %v1305_v17 = vpack.c.b16 %v459_v16, %v459_v16 }
  0xc8   : > { %328 = vrot.lane.b32.xlu0 %v327_v14, %s1142_s8 }
  0xce   : > { %463 = vrot.lane.b32.xlu2 %v1305_v17, %s1143_s9  ;;  %s661_s9 = scalar_lea.hbm %s1410_s5, %s830_s26 }
  0xcf   : > { %531 = vrot.lane.b32.xlu1 %v1299_v12, %s1144_s10  ;;  %s663_s10 = sshll.u32 %s1321_s27, 4  ;;  %s664_s10 = int_to_ptr.vmem [resolvable:$true] %s663_s10 }
  0xd0   : > { %395 = vrot.lane.b32.xlu0 %v1301_v13, %s1145_s11  ;;  %s665_s11 = sshll.u32 %s661_s9, 4  ;;  %s666_s11 = int_to_ptr.hbm [resolvable:$true] %s665_s11 }
  0xd8   : > { %461 = vrot.lane.b32.xlu0 %v1305_v17, %s1146_s14  ;;  %s637_s14 = scalar_lea.sflag [#allocation12], %s1284_s22 }
 0x120   : > { %v530_v18 = vpop.permute.xlu2 %529 }
 0x128   : > { %v464_v19 = vpop.permute.xlu2 %463 }
 0x129   : > { %v469_v20 = vsel %vm330_vm2, %v464_v19, 0 }
 0x12a   : > { %478 = vmatpush.bf16.xpose.msrb.mxu0 %v469_v20 }
 0x139   : > { %v394_v21 = vpop.permute.xlu1 %393 }
 0x13a   : > { %v329_v22 = vpop.permute.xlu0 %328 }
 0x13b   : > { %v335_v23 = vsel %vm330_vm2, %v329_v22, 0 }
 0x13c   : > { %344 = vmatpush.bf16.xpose.msra.mxu1 %v335_v23 }
 0x141   : > { %v532_v24 = vpop.permute.xlu1 %531 }
 0x142   : > { %v396_v25 = vpop.permute.xlu0 %395  ;;  %v537_v26 = vsel %vm330_vm2, %v532_v24, 0 }
 0x143   : > { %810 = vmatmul.msk.bf16.vlgmr.msra.gmra.mxu1 %vm330_vm2, %v324_v8  ;;  %v401_v27 = vsel %vm330_vm2, %v396_v25, 0 }
 0x144   : > { %410 = vmatpush.bf16.xpose.msra.mxu3 %v401_v27 }
 0x14a   : > { %v462_v28 = vpop.permute.xlu0 %461 }
 0x14b   : > { %812 = vmatmul.msk.bf16.vlgmr.msra.gmra.mxu3 %vm330_vm2, %v394_v21  ;;  %814 = vmatmul.msk.bf16.vlgmr.msrb.gmra.mxu0 %vm330_vm2, %v462_v28 }
 0x14c   : > { %546 = vmatpush.bf16.xpose.msrb.mxu3 %v537_v26 }
 0x15b   : > { %816 = vmatmul.msk.bf16.vlgmr.msrb.gmra.mxu3 %vm330_vm2, %v530_v18 }
 0x1c0   : > { %v346_v29 = vpop.f32.mrf.mxu1 }
 0x1c1   : > { %351 = vst.msk [vmem:[%s1321_s27] sm:$0x1] %vm350_vm3, %v346_v29  ;;  %v352_v30 = vsel %vm330_vm2, %v346_v29, -inf }
 0x1c2   : > { %353 = vmax.xlane.f32.xlu1 %v352_v30 }
 0x1c8   : > { %v348_v31 = vpop.f32.mrf.mxu1  ;;  %v480_v32 = vpop.f32.mrf.mxu0 }
 0x1c9   : > { %484 = vst.msk [vmem:[%s1321_s27 + $0x2] sm:$0x1] %vm350_vm3, %v480_v32  ;;  %v485_v37 = vsel %vm330_vm2, %v480_v32, -inf }
 0x1ce   : > { %v412_v33 = vpop.f32.mrf.mxu3 }
 0x1cf   : > { %416 = vst.msk [vmem:[%s1321_s27 + $0x1] sm:$0x1] %vm350_vm3, %v412_v33  ;;  %v417_v34 = vsel %vm330_vm2, %v412_v33, -inf }
 0x1d0   : > { %418 = vmax.xlane.f32.xlu2 %v417_v34  ;;  %v482_v35 = vpop.f32.mrf.mxu0  ;;  %v835_v34 = vld [vmem:[#allocation9] sm:$0xff] }
 0x1d6   : > { %v414_v36 = vpop.f32.mrf.mxu3 }
 0x1d8   : > { %486 = vmax.xlane.f32.xlu2 %v485_v37 }
 0x1de   : > { %v548_v38 = vpop.f32.mrf.mxu3 }
 0x1df   : > { %552 = vst.msk [vmem:[%s1321_s27 + $0x3] sm:$0x1] %vm350_vm3, %v548_v38  ;;  %v553_v39 = vsel %vm330_vm2, %v548_v38, -inf }
 0x1e0   : > { %554 = vmax.xlane.f32.xlu0 %v553_v39 }
 0x1e6   : > { %v550_v40 = vpop.f32.mrf.mxu3 }
 0x1f0   : > { %364 = vrot.lane.b32.xlu2 %v327_v14, %s1147_s28  ;;  %s1046_s28 = sshra.s32 %s666_s11, 4  ;;  %s1047_s28 = int_to_ptr.hbm [resolvable:$true] %s1046_s28 }
 0x1f1   : > { %p1053_p12 = scmp.lt.s32.totalorder %s1047_s28, %s1410_s5 }
 0x1f8   : > { %565 = vrot.lane.b32.xlu2 %v1299_v12, %s1148_s29  ;;  %s1048_s29 = scalar_lea.hbm %s1047_s28, 4 }
 0x1f9   : > { %p1049_p1 = scmp.ne.s32.totalorder %s1047_s28, %s1048_s29 }
 0x1fb   : > { %p1050_p3 = pnand %p1049_p1, %p1253_p4 }
 0x1fd   : > { %p1051_p5 = pneg %p1050_p3 }
 0x235   : > { %v354_v41 = vpop.xlane.xlu1 %353 }
 0x236   : > { %v355_v42 = vsub.f32 %v346_v29, %v354_v41 }
 0x238   : > { %v356_v43 = vmul.f32 1.442695, %v355_v42 }
 0x23a   : > { %926 = vpow2.f32 %v356_v43 }
 0x240   : > { %v927_v44 = vpop.eup %926 }
 0x241   : > { %v358_v45 = vsel %vm330_vm2, %v927_v44, 0.0 }
 0x242   : > { %359 = vadd.xlane.f32.xlu1 %v358_v45 }
 0x243   : > { %v419_v46 = vpop.xlane.xlu2 %418 }
 0x244   : > { %v420_v49 = vsub.f32 %v412_v33, %v419_v46  ;;  %v836_v33 = vld [vmem:[#allocation9 + $0x8] sm:$0xff] }
 0x245   : > { %623 = vmatpush.bf16.msra.mxu0 %v836_v33 }
 0x246   : > { %v421_v51 = vmul.f32 1.442695, %v420_v49 }
 0x249   : > { %624 = vmatpush.bf16.msra.mxu0 %v835_v34 }
 0x24b   : > { %v487_v47 = vpop.xlane.xlu2 %486 }
 0x24c   : > { %v488_v48 = vsub.f32 %v480_v32, %v487_v47 }
 0x24e   : > { %v489_v50 = vmul.f32 1.442695, %v488_v48 }
 0x250   : > { %928 = vpow2.f32 %v489_v50 }
 0x251   : > { %930 = vpow2.f32 %v421_v51 }
 0x253   : > { %v555_v52 = vpop.xlane.xlu0 %554  ;;  %v365_v53 = vpop.permute.xlu2 %364 }
 0x254   : > { %v371_v54 = vsel %vm369_vm4, %v365_v53, 0  ;;  %v556_v56 = vsub.f32 %v548_v38, %v555_v52 }
 0x255   : > { %380 = vmatpush.bf16.msra.mxu2 %v371_v54 }
 0x256   : > { %v929_v55 = vpop.eup %928  ;;  %v557_v58 = vmul.f32 1.442695, %v556_v56 }
 0x257   : > { %v491_v57 = vsel %vm330_vm2, %v929_v55, 0.0  ;;  %v931_v59 = vpop.eup %930 }
 0x258   : > { %492 = vadd.xlane.f32.xlu0 %v491_v57  ;;  %932 = vpow2.f32 %v557_v58  ;;  %v423_v60 = vsel %vm330_vm2, %v931_v59, 0.0 }
 0x25b   : > { %429 = vrot.lane.b32.xlu1 %v1301_v13, %s1149_s30  ;;  %v566_v4 = vpop.permute.xlu2 %565 }
 0x25c   : > { %v571_v7 = vsel %vm369_vm4, %v566_v4, 0 }
 0x25e   : > { %v933_v61 = vpop.eup %932 }
 0x25f   : > { %v559_v62 = vsel %vm330_vm2, %v933_v61, 0.0 }
 0x260   : > { %424 = vadd.xlane.f32.xlu0 %v423_v60 }
 0x268   : > { %560 = vadd.xlane.f32.xlu0 %v559_v62 }
 0x27c   : > { %497 = vrot.lane.b32.xlu0 %v1305_v17, %s1150_s16 }
 0x2b5   : > { %v360_v63 = vpop.xlane.xlu1 %359 }
 0x2b6   : > { %934 = vrcp.f32 %v360_v63 }
 0x2bc   : > { %v935_v0 = vpop.eup %934 }
 0x2bd   : > { %v362_v1 = vmul.f32 %v935_v0, %v927_v44 }
 0x2bf   : > { %v363_v2 = vpack.c.bf16 %v362_v1, %v362_v1 }
 0x2c1   : > { %811 = vmatmul.msk.bf16.vlgmr.msra.gmra.mxu2 %vm330_vm2, %v363_v2 }
 0x2cb   : > { %v493_v3 = vpop.xlane.xlu0 %492 }
 0x2cd   : > { %v430_v5 = vpop.permute.xlu1 %429 }
 0x2ce   : > { %v435_v6 = vsel %vm369_vm4, %v430_v5, 0 }
 0x2cf   : > { %444 = vmatpush.bf16.msrb.mxu2 %v435_v6 }
 0x2d3   : > { %580 = vmatpush.bf16.msra.mxu2 %v571_v7  ;;  %v425_v8 = vpop.xlane.xlu0 %424 }
 0x2d4   : > { %936 = vrcp.f32 %v425_v8 }
 0x2da   : > { %v937_v9 = vpop.eup %936 }
 0x2db   : > { %v427_v10 = vmul.f32 %v937_v9, %v931_v59  ;;  %v561_v11 = vpop.xlane.xlu0 %560 }
 0x2dc   : > { %938 = vrcp.f32 %v561_v11 }
 0x2dd   : > { %v428_v12 = vpack.c.bf16 %v427_v10, %v427_v10  ;;  %940 = vrcp.f32 %v493_v3 }
 0x2df   : > { %813 = vmatmul.msk.bf16.vlgmr.msrb.gmra.mxu2 %vm330_vm2, %v428_v12 }
 0x2e2   : > { %v939_v13 = vpop.eup %938 }
 0x2e3   : > { %v563_v14 = vmul.f32 %v939_v13, %v933_v61  ;;  %v941_v15 = vpop.eup %940 }
 0x2e4   : > { %v495_v16 = vmul.f32 %v941_v15, %v929_v55 }
 0x2e5   : > { %v564_v17 = vpack.c.bf16 %v563_v14, %v563_v14 }
 0x2e6   : > { %v496_v20 = vpack.c.bf16 %v495_v16, %v495_v16 }
 0x2ee   : > { %v498_v18 = vpop.permute.xlu0 %497 }
 0x2ef   : > { %817 = vmatmul.msk.bf16.vlgmr.msra.gmra.mxu2 %vm330_vm2, %v564_v17  ;;  %v503_v19 = vsel %vm369_vm4, %v498_v18, 0 }
 0x2f0   : > { %512 = vmatpush.bf16.msrb.mxu1 %v503_v19 }
 0x2f3   : > { %815 = vmatmul.msk.bf16.vlgmr.msrb.gmra.mxu1 %vm330_vm2, %v496_v20 }
 0x344   : > { %v382_v21 = vpop.f32.mrf.mxu2 }
 0x345   : > { %v386_v22 = vpack.c.bf16 %v382_v21, %v382_v21 }
 0x347   : > { %388 = vst.msk [vmem:[#allocation3] sm:$0xf] %vm387_vm5, %v386_v22 }
 0x34c   : > { %v384_v23 = vpop.f32.mrf.mxu2 }
 0x362   : > { %v446_v24 = vpop.f32.mrf.mxu2 }
 0x363   : > { %v450_v25 = vpack.c.bf16 %v446_v24, %v446_v24 }
 0x365   : > { %452 = vrot.lane.b32.xlu1 %v450_v25, %s1151_s6  ;;  %s1052_s6 = scalar_lea.hbm %s1410_s5, 8 }
 0x366   : > { %p1054_p7 = scmp.lt.s32.totalorder %s1052_s6, %s1048_s29 }
 0x368   : > { %p1055_p8 = por %p1054_p7, %p1053_p12 }
 0x36a   : > { %v448_v26 = vpop.f32.mrf.mxu2  ;;  %p1056_p9 = pnand %p1055_p8, %p1051_p5 }
 0x370   : > { %v514_v27 = vpop.f32.mrf.mxu1 }
 0x371   : > { %v518_v28 = vpack.c.bf16 %v514_v27, %v514_v27 }
 0x372   : > { %v582_v29 = vpop.f32.mrf.mxu2 }
 0x373   : > { %v586_v30 = vpack.c.bf16 %v582_v29, %v582_v29  ;;  %520 = vrot.lane.b32.xlu2 %v518_v28, %s1152_s7 }
 0x375   : > { %588 = vrot.lane.b32.xlu1 %v586_v30, %s1153_s13 }
 0x378   : > { %v516_v31 = vpop.f32.mrf.mxu1 }
 0x37a   : > { %v584_v32 = vpop.f32.mrf.mxu2 }
 0x3cd   : > { %v521_v36 = vpop.permute.xlu2 %520 }
 0x3d7   : > { %v453_v35 = vpop.permute.xlu1 %452 }
 0x3d8   : > { %456 = vst.msk [vmem:[#allocation3] sm:$0xf] %vm455_vm6, %v453_v35 }
 0x3d9   : > { %524 = vst.msk [vmem:[#allocation3] sm:$0xf] %vm523_vm7, %v521_v36 }
 0x3e7   : > { %v589_v37 = vpop.permute.xlu1 %588 }
 0x3e8   : > { %592 = vst.msk [vmem:[#allocation3] sm:$0xf] %vm591_vm8, %v589_v37 }
 0x3ef   : > { %v593_v38 = vld [vmem:[#allocation3] sm:$0xf] }
 0x3f0   : > { %826 = vmatmul.msk.bf16.vlgmr.msra.gmra.mxu0 %vm304_vm0, %v593_v38 }
 0x3f1   : > { %1059 = shalt.err (!%p1056_p9)
}
 0x3f2   : > { %848 = dma.vmem_to_hbm [thread:$0]  (%p1253_p4), %s664_s10, 64, %s666_s11, %s637_s14   ;;  %v925_v39 = vld [vmem:[%s1408_s3] ss:$0 sm:$0xff] }
 0x3f3   : > { %s829_s27 = sshll.u32 %s1208_s25, 3  ;;  %s799_s26 = sshll.u32 %s1284_s22, 3 }
 0x3f4   : > { %s647_s9 = scalar_lea.hbm %s1409_s4, %s829_s27  ;;  %s278_s28 = scalar_lea.vmem [#allocation10], %s799_s26 }
 0x3f5   : > { %s649_s29 = sshll.u32 %s278_s28, 4  ;;  %s651_s6 = sshll.u32 %s647_s9, 4  ;;  %s650_s29 = int_to_ptr.vmem [resolvable:$true] %s649_s29  ;;  %s652_s6 = int_to_ptr.hbm [resolvable:$true] %s651_s6 }
 0x3f6   : > { %s632_s25 = scalar_lea.sflag [#allocation6], %s1284_s22  ;;  %s1074_s10 = sshra.s32 %s652_s6, 4  ;;  %s1075_s10 = int_to_ptr.hbm [resolvable:$true] %s1074_s10 }
 0x3f7   : > { %s1076_s11 = scalar_lea.hbm %s1075_s10, 8  ;;  %s1080_s13 = scalar_lea.hbm %s1409_s4, 16 }
 0x3f8   : > { %p1077_p10 = scmp.ne.s32.totalorder %s1075_s10, %s1076_s11  ;;  %p1081_p0 = scmp.lt.s32.totalorder %s1075_s10, %s1409_s4 }
 0x3f9   : > { %p1082_p2 = scmp.lt.s32.totalorder %s1080_s13, %s1076_s11 }
 0x3fa   : > { %p1078_p13 = pnand %p1077_p10, %p1253_p4 }
 0x3fb   : > { %p1083_p1 = por %p1082_p2, %p1081_p0 }
 0x3fc   : > { %p1079_p11 = pneg %p1078_p13 }
 0x3fe   : > { %p1084_p3 = pnand %p1083_p1, %p1079_p11 }
 0x46d   : > { %v626_v40 = vpop.f32.mrf.mxu0 }
 0x46e   : > { %v627_v41 = vadd.f32 %v925_v39, %v626_v40 }
 0x470   : > { %630 = vst.msk [vmem:[%s278_s28] sm:$0xff] %vm304_vm0, %v627_v41 }
 0x471   : > { %1087 = shalt.err (!%p1084_p3)
}
 0x472   : > { %847 = dma.vmem_to_hbm [thread:$0]  (%p1253_p4), %s650_s29, 128, %s652_s6, %s632_s25  }
 0x475   : > { %v628_v42 = vpop.f32.mrf.mxu0 }
 0x476 PF: > { %s677_s22 = sand.u32 1, %s1122_s18   ;;  %p1417_p5 = scmp.ge.s32.totalorder %s1134_s21, 2 }
 0x477   : > { %s678_s17 = scalar_lea.sflag [#allocation6], %s677_s22 }
 0x478   : > { %p863_p12 = pnand %p1417_p5, %p1257_p6 }
 0x47a   : > { %p864_p7 = pneg %p863_p12 }
 0x47c   : > { %1113 = dma.done.wait (%p864_p7), %s678_s17, 128  }
 0x47d   : > { %1115 = vsyncadd (%p864_p7), %s678_s17, 4294967168  ;;  %s688_s8 = scalar_lea.sflag [#allocation12], %s677_s22 }
 0x47e   : > { %1117 = dma.done.wait (%p864_p7), %s688_s8, 64  }
 0x47f   : > { %1119 = vsyncadd (%p864_p7), %s688_s8, 4294967232  ;;  %p23_p4 = scmp.ge.s32.totalorder %s1227_s12, 4   ;;  %s1418_s18 = smov %s1126_s19 }
 0x480   : > { %s1419_s19 = smov %s1130_s20  ;;  %s1420_s20 = smov %s1238_s15 }
 0x481   : > { %s1421_s21 = smov %s1227_s12  ;;  %25 = sbr.rel (!%p23_p4) target bundleno = 8 (0x8), region = 106 }
 0x486   :  { %694 = vsyncpa [#allocation5], 1 }
 0x487   :  { %696 = vsyncpa [#allocation5 + $0x1], 1 }
 0x488   :  { %697 = vsyncpa [#allocation8], 1 }
 0x489   :  { %698 = vsyncpa [#allocation6], 1 }
 0x48a   :  { %700 = vsyncpa [#allocation6 + $0x1], 1 }
 0x48b   :  { %701 = vsyncpa [#allocation12], 1 }
 0x48c   :  { %703 = vsyncpa [#allocation12 + $0x1], 1 }

</bundles_post_ra>
